<compile_context>
chip_gen: v7x
topology: tpu7x:2x2x1
jax: 0.10.0
libtpu: 0.0.40
codegen_flags: <defaults>
</compile_context>

<pallas_src>
import jax
import jax.numpy as jnp
from jax.experimental import pallas as pl
from jax.experimental.pallas import tpu as pltpu


def _round_up(n, m):
    return ((n + m - 1) // m) * m


def mlp_kernel(x_ref, w1_ref, b1_ref, w2_ref, b2_ref, o_ref):
    # first linear layer: bf16 inputs, f32 MXU accumulate
    h = jnp.dot(x_ref[...], w1_ref[...], preferred_element_type=jnp.float32)
    # bias + ReLU  (F.relu(input_layer(x)))
    h = jnp.maximum(h + b1_ref[...], 0.0)
    # second linear layer + bias  (hidden_layer(h))
    out = jnp.dot(h, w2_ref[...], preferred_element_type=jnp.float32)
    o_ref[...] = (out + b2_ref[...]).astype(o_ref.dtype)
    # dropout_ratio == 0 in this config -> nn.Dropout is the identity.
    # TODO(synk): if dropout_ratio > 0 were needed, use pltpu.prng_seed +
    # pltpu.stateful_bernoulli to build the mask inside the kernel.


def mlp_forward(x_nchw, w1, b1, w2, b2, *, bm=256):
    """x_nchw: (B, C, H, W) float32.  Returns (B, num_classes) float32."""
    B = x_nchw.shape[0]
    x = x_nchw.reshape(B, -1)                      # (B, D) == input_data.view(B, -1)
    D = x.shape[1]
    H = w1.shape[1]
    C = w2.shape[1]

    # ---- padding for lane/sublane-friendly tiles ----
    Hp = _round_up(H, 128)                         # hidden dim lane-aligned
    Cp = _round_up(C, 128)                         # lane-dense output block
    if B <= bm:                                    # small batch: single grid step
        Bp = _round_up(B, 8)
        bm_eff = Bp
    else:                                          # large batch: 256-row M tiles
        Bp = _round_up(B, bm)
        bm_eff = bm

    # bf16 activations / W1 (dominant HBM term); W2/biases stay f32 (tiny)
    x_p = jnp.zeros((Bp, D), jnp.bfloat16).at[:B, :].set(x.astype(jnp.bfloat16))
    w1_p = jnp.zeros((D, Hp), jnp.bfloat16).at[:, :H].set(w1.astype(jnp.bfloat16))
    b1_p = jnp.zeros((1, Hp), jnp.float32).at[:, :H].set(b1.reshape(1, H))
    w2_p = jnp.zeros((Hp, Cp), jnp.float32).at[:H, :C].set(w2)
    b2_p = jnp.zeros((1, Cp), jnp.float32).at[:, :C].set(b2.reshape(1, C))

    # VMEM budget: resident weights/biases + double-buffered x/out tiles + h.
    resident = w1_p.size * 2 + w2_p.size * 4 + b1_p.size * 4 + b2_p.size * 4
    per_step = 2 * (bm_eff * D * 2 + bm_eff * Cp * 4) + bm_eff * Hp * 4
    vmem_bytes = resident + per_step + (4 << 20)          # + 4 MiB margin
    vmem_bytes = int(min(max(vmem_bytes, 32 << 20), 56 << 20))  # < 64 MiB (v7x)

    grid = (Bp // bm_eff,)
    out = pl.pallas_call(
        mlp_kernel,
        out_shape=jax.ShapeDtypeStruct((Bp, Cp), jnp.float32),
        grid_spec=pltpu.PrefetchScalarGridSpec(
            num_scalar_prefetch=0,
            grid=grid,
            in_specs=[
                pl.BlockSpec((bm_eff, D), lambda i: (i, 0)),   # x: M-tiled
                pl.BlockSpec((D, Hp), lambda i: (0, 0)),       # W1 resident
                pl.BlockSpec((1, Hp), lambda i: (0, 0)),       # b1 resident
                pl.BlockSpec((Hp, Cp), lambda i: (0, 0)),      # W2 resident
                pl.BlockSpec((1, Cp), lambda i: (0, 0)),       # b2 resident
            ],
            out_specs=pl.BlockSpec((bm_eff, Cp), lambda i: (i, 0)),
        ),
        compiler_params=pltpu.CompilerParams(
            dimension_semantics=("parallel",),   # M axis -> megacore on v7x
            vmem_limit_bytes=vmem_bytes,
        ),
    )(x_p, w1_p, b1_p, w2_p, b2_p)

    return out[:B, :C]


def init_params(key, input_dim, hidden_dim, num_classes):
    """Deterministic init mirroring the PyTorch module:
    kaiming_normal_ on weights (fan_in mode, relu gain),
    nn.Linear default uniform(-1/sqrt(fan_in), 1/sqrt(fan_in)) on biases."""
    k1, k2, k3, k4 = jax.random.split(key, 4)
    std1 = (2.0 / input_dim) ** 0.5
    std2 = (2.0 / hidden_dim) ** 0.5
    w1_t = jax.random.normal(k1, (input_dim, hidden_dim), jnp.float32) * std1   # (D, H)
    w2_t = jax.random.normal(k2, (hidden_dim, num_classes), jnp.float32) * std2  # (H, C)
    bnd1 = 1.0 / (input_dim ** 0.5)
    bnd2 = 1.0 / (hidden_dim ** 0.5)
    b1 = jax.random.uniform(k3, (hidden_dim,), jnp.float32, -bnd1, bnd1)
    b2 = jax.random.uniform(k4, (num_classes,), jnp.float32, -bnd2, bnd2)
    return w1_t, b1, w2_t, b2


if __name__ == "__main__":
    key = jax.random.PRNGKey(0)
    kx, kp = jax.random.split(key)

    # cifar10 config: input_layer_dim = 3072, num_classes = 10.
    # Small hidden dim (256 instead of the PyTorch default 2000) and small batch.
    B, CIN, HW = 8, 3, 32
    INPUT_DIM = CIN * HW * HW          # 3072
    HIDDEN_DIM = 256
    NUM_CLASSES = 10

    x = jax.random.normal(kx, (B, CIN, HW, HW), jnp.float32)   # NCHW
    w1, b1, w2, b2 = init_params(kp, INPUT_DIM, HIDDEN_DIM, NUM_CLASSES)

    out = mlp_forward(x, w1, b1, w2, b2)
    out = jax.block_until_ready(out)
    assert out.shape == (B, NUM_CLASSES)

    # reference with the same bf16 inputs to the first matmul (f32 accumulate)
    xf = x.reshape(B, -1)
    h_ref = jnp.dot(xf.astype(jnp.bfloat16), w1.astype(jnp.bfloat16),
                    preferred_element_type=jnp.float32)
    ref = jnp.maximum(h_ref + b1, 0.0) @ w2 + b2
    assert jnp.allclose(out, ref, atol=2e-3, rtol=2e-3), "mismatch vs bf16 reference"

    # sanity check against the pure-f32 math (loose tolerance due to bf16 weights)
    ref_f32 = jnp.maximum(xf @ w1 + b1, 0.0) @ w2 + b2
    assert jnp.allclose(out, ref_f32, atol=5e-2, rtol=5e-2), "mismatch vs f32 reference"

    print("KERNEL_OK")
</pallas_src>

<mosaic_0001>
module attributes {stable_mosaic.version = 11 : i64} {
  func.func @mlp_kernel(%arg0: i32, %arg1: memref<8x3072xbf16, #tpu.memory_space<vmem>>, %arg2: memref<3072x256xbf16, #tpu.memory_space<vmem>>, %arg3: memref<1x256xf32, #tpu.memory_space<vmem>>, %arg4: memref<256x128xf32, #tpu.memory_space<vmem>>, %arg5: memref<1x128xf32, #tpu.memory_space<vmem>>, %arg6: memref<8x128xf32, #tpu.memory_space<vmem>>) attributes {dimension_semantics = [#tpu.dimension_semantics<parallel>], iteration_bounds = array<i64: 1>, scalar_prefetch = 0 : i64, scratch_operands = 0 : i64, tpu.core_type = #tpu.core_type<tc>, window_params = [{transform_indices = @transform_0, window_bounds = array<i64: 8, 3072>}, {pipeline_mode = #tpu.pipeline_mode<synchronous>, transform_indices = @transform_1, window_bounds = array<i64: 3072, 256>}, {pipeline_mode = #tpu.pipeline_mode<synchronous>, transform_indices = @transform_2, window_bounds = array<i64: 1, 256>}, {pipeline_mode = #tpu.pipeline_mode<synchronous>, transform_indices = @transform_3, window_bounds = array<i64: 256, 128>}, {pipeline_mode = #tpu.pipeline_mode<synchronous>, transform_indices = @transform_4, window_bounds = array<i64: 1, 128>}, {transform_indices = @transform_5, window_bounds = array<i64: 8, 128>}]} {
    %c0 = arith.constant 0 : index
    %c0_0 = arith.constant 0 : index
    %0 = vector.load %arg1[%c0, %c0_0] : memref<8x3072xbf16, #tpu.memory_space<vmem>>, vector<8x3072xbf16>
    %c0_1 = arith.constant 0 : index
    %c0_2 = arith.constant 0 : index
    %1 = vector.load %arg2[%c0_1, %c0_2] : memref<3072x256xbf16, #tpu.memory_space<vmem>>, vector<3072x256xbf16>
    %cst = arith.constant dense<0.000000e+00> : vector<8x256xf32>
    %2 = tpu.matmul %0, %1, %cst {dimension_numbers = #tpu.dot_dimension_numbers<[1], [0], [0], [1], [0, 0, 1, 1], [], []>} : vector<8x3072xbf16>, vector<3072x256xbf16>, vector<8x256xf32> -> vector<8x256xf32>
    %c0_3 = arith.constant 0 : index
    %c0_4 = arith.constant 0 : index
    %3 = vector.load %arg3[%c0_3, %c0_4] : memref<1x256xf32, #tpu.memory_space<vmem>>, vector<1x256xf32>
    %4 = vector.broadcast %3 : vector<1x256xf32> to vector<8x256xf32>
    %5 = arith.addf %2, %4 : vector<8x256xf32>
    %cst_5 = arith.constant 0.000000e+00 : f32
    %6 = vector.broadcast %cst_5 : f32 to vector<8x256xf32>
    %7 = arith.maximumf %5, %6 : vector<8x256xf32>
    %c0_6 = arith.constant 0 : index
    %c0_7 = arith.constant 0 : index
    %8 = vector.load %arg4[%c0_6, %c0_7] : memref<256x128xf32, #tpu.memory_space<vmem>>, vector<256x128xf32>
    %cst_8 = arith.constant dense<0.000000e+00> : vector<8x128xf32>
    %9 = tpu.matmul %7, %8, %cst_8 {dimension_numbers = #tpu.dot_dimension_numbers<[1], [0], [0], [1], [0, 0, 1, 1], [], []>} : vector<8x256xf32>, vector<256x128xf32>, vector<8x128xf32> -> vector<8x128xf32>
    %c0_9 = arith.constant 0 : index
    %c0_10 = arith.constant 0 : index
    %10 = vector.load %arg5[%c0_9, %c0_10] : memref<1x128xf32, #tpu.memory_space<vmem>>, vector<1x128xf32>
    %11 = vector.broadcast %10 : vector<1x128xf32> to vector<8x128xf32>
    %12 = arith.addf %9, %11 : vector<8x128xf32>
    %c0_11 = arith.constant 0 : index
    %c0_12 = arith.constant 0 : index
    %13 = vector.load %arg6[%c0_11, %c0_12] : memref<8x128xf32, #tpu.memory_space<vmem>>, vector<8x128xf32>
    tpu.vector_store %arg6[%c0_11, %c0_12], %12 {strides = array<i32>} : memref<8x128xf32, #tpu.memory_space<vmem>>, vector<8x128xf32>,
    return
  }
  func.func @transform_0(%arg0: i32) -> (i32, i32) {
    %c0_i32 = arith.constant 0 : i32
    %c0_i32_0 = arith.constant 0 : i32
    return %arg0, %c0_i32 : i32, i32
  }
  func.func @transform_1(%arg0: i32) -> (i32, i32) {
    %c0_i32 = arith.constant 0 : i32
    %c0_i32_0 = arith.constant 0 : i32
    %c0_i32_1 = arith.constant 0 : i32
    return %c0_i32, %c0_i32_0 : i32, i32
  }
  func.func @transform_2(%arg0: i32) -> (i32, i32) {
    %c0_i32 = arith.constant 0 : i32
    %c0_i32_0 = arith.constant 0 : i32
    %c0_i32_1 = arith.constant 0 : i32
    return %c0_i32, %c0_i32_0 : i32, i32
  }
  func.func @transform_3(%arg0: i32) -> (i32, i32) {
    %c0_i32 = arith.constant 0 : i32
    %c0_i32_0 = arith.constant 0 : i32
    %c0_i32_1 = arith.constant 0 : i32
    return %c0_i32, %c0_i32_0 : i32, i32
  }
  func.func @transform_4(%arg0: i32) -> (i32, i32) {
    %c0_i32 = arith.constant 0 : i32
    %c0_i32_0 = arith.constant 0 : i32
    %c0_i32_1 = arith.constant 0 : i32
    return %c0_i32, %c0_i32_0 : i32, i32
  }
  func.func @transform_5(%arg0: i32) -> (i32, i32) {
    %c0_i32 = arith.constant 0 : i32
    %c0_i32_0 = arith.constant 0 : i32
    return %arg0, %c0_i32 : i32, i32
  }
}

</mosaic_0001>

<bundles_post_ra>
// kernel: tpu_custom_call.1
= control target key start
LH: loop header
LB: loop body
LE: loop exit
PB: predicated region body
PF: predicated region fallthrough
CT: control target
= control target key end

     0   :  { %10 = vsyncpa [#allocation3], 0  ;;  %s4554_s0 = inlined_call_operand.hbm [shape: bf16[8,3072], index: 0, kind: input, shape index: {}]   ;;  %s4555_s1 = inlined_call_operand.hbm [shape: bf16[3072,256], index: 1, kind: input, shape index: {}]   ;;  %s4556_s2 = inlined_call_operand.hbm [shape: f32[1,256], index: 2, kind: input, shape index: {}]   ;;  %s4557_s3 = inlined_call_operand.hbm [shape: f32[256,128], index: 3, kind: input, shape index: {}]   ;;  %s4558_s4 = inlined_call_operand.hbm [shape: f32[1,128], index: 4, kind: input, shape index: {}]   ;;  %s4559_s5 = inlined_call_operand.hbm [shape: f32[8,128], index: 5, kind: output, shape index: {}]  }
   0x1   :  { %11 = vsyncpa [#allocation6], 0 }
   0x2   :  { %12 = vsyncpa [#allocation9], 0 }
   0x3   :  { %13 = vsyncpa [#allocation4], 0  ;;  %s4384_s18 = smov [#allocation5]   ;;  %s4244_s22 = scalar_lea.hbm %s4555_s1, 49152 }
   0x4   :  { %s29_s19 = sshll.u32 %s4384_s18, 4  ;;  %p4245_p0 = scmp.ne.s32.totalorder %s4555_s1, %s4244_s22  ;;  %s30_s19 = int_to_ptr.vmem [resolvable:$true] %s29_s19 }
   0x5   :  { %p4248_p1 = scmp.lt.u32.totalorder %s4244_s22, %s4555_s1 }
   0x7   :  { %p4250_p2 = pnand %p4248_p1, %p4245_p0 }
   0x9   :  { %4253 = shalt.err (!%p4250_p2)
}
   0xa   :  { %s4254_s27 = scalar_lea.vmem %s30_s19, 49152  ;;  %p4259_p4 = scmp.lt.s32.totalorder %s30_s19, %s30_s19 }
   0xb   :  { %p4255_p3 = scmp.ne.s32.totalorder %s30_s19, %s4254_s27  ;;  %p4260_p5 = scmp.lt.s32.totalorder %s4254_s27, %s4254_s27 }
   0xd   :  { %p4261_p6 = por %p4260_p5, %p4259_p4 }
   0xf   :  { %p4262_p7 = pnand %p4261_p6, %p4255_p3 }
  0x11   :  { %4265 = shalt.err (!%p4262_p7)
}
  0x12   :  { %s4385_s28 = smov 128   ;;  %s4386_s29 = smov 8  }
  0x13   :  { %35 = dma.hbm_to_vmem [thread:$0]  %s4555_s1, 49152, %s30_s19, [#allocation6], %s4385_s28, %s4385_s28, %s4386_s29  }
  0x14   :  { %s4387_s7 = smov [#allocation8]   ;;  %s4388_s9 = smov [#allocation2]  }
  0x15   :  { %s51_s8 = sshll.u32 %s4387_s7, 4  ;;  %s20_s10 = sshll.u32 %s4388_s9, 4  ;;  %s52_s8 = int_to_ptr.vmem [resolvable:$true] %s51_s8  ;;  %s21_s10 = int_to_ptr.vmem [resolvable:$true] %s20_s10 }
  0x16   :  { %s4266_s13 = scalar_lea.hbm %s4557_s3, 4096 }
  0x17   :  { %p4267_p8 = scmp.ne.s32.totalorder %s4557_s3, %s4266_s13  ;;  %p4270_p9 = scmp.lt.u32.totalorder %s4266_s13, %s4557_s3 }
  0x19   :  { %p4272_p10 = pnand %p4270_p9, %p4267_p8 }
  0x1b   :  { %4275 = shalt.err (!%p4272_p10)
}
  0x1c   :  { %s4276_s1 = scalar_lea.vmem %s52_s8, 4096  ;;  %p4281_p12 = scmp.lt.s32.totalorder %s52_s8, %s52_s8 }
  0x1d   :  { %p4277_p11 = scmp.ne.s32.totalorder %s52_s8, %s4276_s1  ;;  %p4282_p13 = scmp.lt.s32.totalorder %s4276_s1, %s4276_s1 }
  0x1f   :  { %p4283_p0 = por %p4282_p13, %p4281_p12 }
  0x21   :  { %p4284_p1 = pnand %p4283_p0, %p4277_p11 }
  0x23   :  { %4287 = shalt.err (!%p4284_p1)
}
  0x24   :  { %57 = dma.hbm_to_vmem [thread:$0]  %s4557_s3, 4096, %s52_s8, [#allocation9], %s4385_s28, %s4385_s28, %s4386_s29  }
  0x25   :  { %s4288_s22 = scalar_lea.hbm %s4554_s0, 1536 }
  0x26   :  { %p4289_p2 = scmp.ne.s32.totalorder %s4554_s0, %s4288_s22  ;;  %p4292_p3 = scmp.lt.u32.totalorder %s4288_s22, %s4554_s0 }
  0x28   :  { %p4294_p4 = pnand %p4292_p3, %p4289_p2 }
  0x2a   :  { %4297 = shalt.err (!%p4294_p4)
}
  0x2b   :  { %s4298_s27 = scalar_lea.vmem %s21_s10, 1536  ;;  %p4303_p6 = scmp.lt.s32.totalorder %s21_s10, %s21_s10 }
  0x2c   :  { %p4299_p5 = scmp.ne.s32.totalorder %s21_s10, %s4298_s27  ;;  %p4304_p7 = scmp.lt.s32.totalorder %s4298_s27, %s4298_s27 }
  0x2e   :  { %p4305_p8 = por %p4304_p7, %p4303_p6 }
  0x30   :  { %p4306_p9 = pnand %p4305_p8, %p4299_p5 }
  0x32   :  { %4309 = shalt.err (!%p4306_p9)
}
  0x33   :  { %23 = dma.hbm_to_vmem [thread:$0]  %s4554_s0, 1536, %s21_s10, [#allocation3]  }
  0x34   :  { %s4389_s29 = smov [#allocation7]   ;;  %s4390_s6 = smov [#allocation10]  }
  0x35   :  { %s42_s30 = sshll.u32 %s4389_s29, 4  ;;  %s64_s7 = sshll.u32 %s4390_s6, 4  ;;  %s43_s30 = int_to_ptr.vmem [resolvable:$true] %s42_s30  ;;  %s65_s7 = int_to_ptr.vmem [resolvable:$true] %s64_s7 }
  0x36   :  { %s4310_s11 = scalar_lea.hbm %s4556_s2, 32 }
  0x37   :  { %p4311_p10 = scmp.ne.s32.totalorder %s4556_s2, %s4310_s11  ;;  %p4314_p11 = scmp.lt.u32.totalorder %s4310_s11, %s4556_s2 }
  0x39   :  { %p4316_p12 = pnand %p4314_p11, %p4311_p10 }
  0x3b   :  { %4319 = shalt.err (!%p4316_p12)
}
  0x3c   :  { %s4320_s0 = scalar_lea.vmem %s43_s30, 32  ;;  %p4325_p0 = scmp.lt.s32.totalorder %s43_s30, %s43_s30 }
  0x3d   :  { %p4321_p13 = scmp.ne.s32.totalorder %s43_s30, %s4320_s0  ;;  %p4326_p1 = scmp.lt.s32.totalorder %s4320_s0, %s4320_s0 }
  0x3f   :  { %p4327_p2 = por %p4326_p1, %p4325_p0 }
  0x41   :  { %p4328_p3 = pnand %p4327_p2, %p4321_p13 }
  0x43   :  { %4331 = shalt.err (!%p4328_p3)
}
  0x44   :  { %45 = dma.hbm_to_vmem [thread:$0]  %s4556_s2, 32, %s43_s30, [#allocation6]  }
  0x45   :  { %s4332_s18 = scalar_lea.hbm %s4558_s4, 16 }
  0x46   :  { %p4333_p4 = scmp.ne.s32.totalorder %s4558_s4, %s4332_s18  ;;  %p4336_p5 = scmp.lt.u32.totalorder %s4332_s18, %s4558_s4 }
  0x48   :  { %p4338_p6 = pnand %p4336_p5, %p4333_p4 }
  0x4a   :  { %4341 = shalt.err (!%p4338_p6)
}
  0x4b   :  { %s4342_s23 = scalar_lea.vmem %s65_s7, 16  ;;  %s4346_s24 = scalar_lea.vmem %s65_s7, 32 }
  0x4c   :  { %p4343_p7 = scmp.ne.s32.totalorder %s65_s7, %s4342_s23  ;;  %p4347_p8 = scmp.lt.s32.totalorder %s65_s7, %s65_s7 }
  0x4d   :  { %p4348_p9 = scmp.lt.s32.totalorder %s4346_s24, %s4342_s23 }
  0x4f   :  { %p4349_p10 = por %p4348_p9, %p4347_p8 }
  0x51   :  { %p4350_p11 = pnand %p4349_p10, %p4343_p7 }
  0x53   :  { %4353 = shalt.err (!%p4350_p11)
}
  0x54   :  { %67 = dma.hbm_to_vmem [thread:$0]  %s4558_s4, 16, %s65_s7, [#allocation9]  }
  0x55   :  { %4376 = dma.done.wait [#allocation3], 1536  }
  0x56   :  { %4377 = vsyncadd [#allocation3], 4294965760 }
  0x57   :  { %4378 = dma.done.wait [#allocation6], 49184  }
  0x58   :  { %4379 = vsyncadd [#allocation6], 4294918112 }
  0x59   :  { %4380 = dma.done.wait [#allocation9], 4112  }
  0x5a   :  { %4381 = vsyncadd [#allocation9], 4294963184  ;;  %v3644_v0 = vld [vmem:[#allocation5 + $0x4] ss:$8 sps:$4 sm:$0xff]   ;;  %v3648_v2 = vld [vmem:[#allocation5] ss:$8 sps:$4 sm:$0xff]  }
  0x5b   :  { %v3646_v1 = vld [vmem:[#allocation5 + $0x604] ss:$8 sps:$4 sm:$0xff]   ;;  %2495 = vmatprep.subr.bf16.mxu1 %v3644_v0  ;;  %v3649_v3 = vld [vmem:[#allocation5 + $0x600] ss:$8 sps:$4 sm:$0xff]   ;;  %v3650_v4 = vld [vmem:[#allocation5 + $0x14] ss:$8 sps:$4 sm:$0xff]  }
  0x5c   :  { %2741 = vmatprep.subr.bf16.mxu0 %v3646_v1  ;;  %2496 = vmatpush1.bf16.msra.mxu1 %v3648_v2  ;;  %v3652_v5 = vld [vmem:[#allocation5 + $0x614] ss:$8 sps:$4 sm:$0xff]   ;;  %v3654_v6 = vld [vmem:[#allocation5 + $0x10] ss:$8 sps:$4 sm:$0xff]   ;;  %v3656_v8 = vld [vmem:[#allocation5 + $0x24] ss:$8 sps:$4 sm:$0xff]  }
  0x5d   :  { %2742 = vmatpush1.bf16.msra.mxu0 %v3649_v3  ;;  %2497 = vmatprep.subr.bf16.mxu1 %v3650_v4  ;;  %v3655_v7 = vld [vmem:[#allocation5 + $0x610] ss:$8 sps:$4 sm:$0xff]   ;;  %v3658_v9 = vld [vmem:[#allocation5 + $0x624] ss:$8 sps:$4 sm:$0xff]   ;;  %v3660_v10 = vld [vmem:[#allocation5 + $0x20] ss:$8 sps:$4 sm:$0xff]  }
  0x5e   :  { %2743 = vmatprep.subr.bf16.mxu0 %v3652_v5  ;;  %v3661_v11 = vld [vmem:[#allocation5 + $0x620] ss:$8 sps:$4 sm:$0xff]   ;;  %v3662_v12 = vld [vmem:[#allocation5 + $0x34] ss:$8 sps:$4 sm:$0xff]   ;;  %v3666_v14 = vld [vmem:[#allocation5 + $0x30] ss:$8 sps:$4 sm:$0xff]  }
  0x5f   :  { %v3664_v13 = vld [vmem:[#allocation5 + $0x634] ss:$8 sps:$4 sm:$0xff]   ;;  %v3667_v15 = vld [vmem:[#allocation5 + $0x630] ss:$8 sps:$4 sm:$0xff]   ;;  %v3668_v16 = vld [vmem:[#allocation5 + $0x44] ss:$8 sps:$4 sm:$0xff]  }
  0x60   :  { %2498 = vmatpush1.bf16.msra.mxu1 %v3654_v6  ;;  %v3670_v17 = vld [vmem:[#allocation5 + $0x644] ss:$8 sps:$4 sm:$0xff]   ;;  %v3672_v18 = vld [vmem:[#allocation5 + $0x40] ss:$8 sps:$4 sm:$0xff]   ;;  %v3674_v20 = vld [vmem:[#allocation5 + $0x54] ss:$8 sps:$4 sm:$0xff]  }
  0x61   :  { %2744 = vmatpush1.bf16.msra.mxu0 %v3655_v7  ;;  %2499 = vmatprep.subr.bf16.mxu1 %v3656_v8  ;;  %v3673_v19 = vld [vmem:[#allocation5 + $0x640] ss:$8 sps:$4 sm:$0xff]   ;;  %v3676_v21 = vld [vmem:[#allocation5 + $0x654] ss:$8 sps:$4 sm:$0xff]   ;;  %v3678_v22 = vld [vmem:[#allocation5 + $0x50] ss:$8 sps:$4 sm:$0xff]  }
  0x62   :  { %2745 = vmatprep.subr.bf16.mxu0 %v3658_v9  ;;  %v3679_v23 = vld [vmem:[#allocation5 + $0x650] ss:$8 sps:$4 sm:$0xff]   ;;  %v3680_v24 = vld [vmem:[#allocation5 + $0x64] ss:$8 sps:$4 sm:$0xff]   ;;  %v3684_v26 = vld [vmem:[#allocation5 + $0x60] ss:$8 sps:$4 sm:$0xff]  }
  0x63   :  { %v3682_v25 = vld [vmem:[#allocation5 + $0x664] ss:$8 sps:$4 sm:$0xff]   ;;  %v3685_v27 = vld [vmem:[#allocation5 + $0x660] ss:$8 sps:$4 sm:$0xff]   ;;  %v3686_v28 = vld [vmem:[#allocation5 + $0x74] ss:$8 sps:$4 sm:$0xff]  }
  0x64   :  { %2500 = vmatpush1.bf16.msra.mxu1 %v3660_v10  ;;  %v3688_v29 = vld [vmem:[#allocation5 + $0x674] ss:$8 sps:$4 sm:$0xff]   ;;  %v3690_v30 = vld [vmem:[#allocation5 + $0x70] ss:$8 sps:$4 sm:$0xff]   ;;  %v3692_v32 = vld [vmem:[#allocation5 + $0x84] ss:$8 sps:$4 sm:$0xff]  }
  0x65   :  { %2746 = vmatpush1.bf16.msra.mxu0 %v3661_v11  ;;  %2501 = vmatprep.subr.bf16.mxu1 %v3662_v12  ;;  %v3691_v31 = vld [vmem:[#allocation5 + $0x670] ss:$8 sps:$4 sm:$0xff]   ;;  %v3694_v33 = vld [vmem:[#allocation5 + $0x684] ss:$8 sps:$4 sm:$0xff]   ;;  %v3696_v34 = vld [vmem:[#allocation5 + $0x80] ss:$8 sps:$4 sm:$0xff]  }
  0x66   :  { %2747 = vmatprep.subr.bf16.mxu0 %v3664_v13  ;;  %v3697_v35 = vld [vmem:[#allocation5 + $0x680] ss:$8 sps:$4 sm:$0xff]   ;;  %v3698_v36 = vld [vmem:[#allocation5 + $0x94] ss:$8 sps:$4 sm:$0xff]   ;;  %v3702_v38 = vld [vmem:[#allocation5 + $0x90] ss:$8 sps:$4 sm:$0xff]  }
  0x67   :  { %v3700_v37 = vld [vmem:[#allocation5 + $0x694] ss:$8 sps:$4 sm:$0xff]   ;;  %v3703_v39 = vld [vmem:[#allocation5 + $0x690] ss:$8 sps:$4 sm:$0xff]   ;;  %v3704_v40 = vld [vmem:[#allocation5 + $0xa4] ss:$8 sps:$4 sm:$0xff]  }
  0x68   :  { %2502 = vmatpush1.bf16.msra.mxu1 %v3666_v14  ;;  %v3706_v41 = vld [vmem:[#allocation5 + $0x6a4] ss:$8 sps:$4 sm:$0xff]   ;;  %v3708_v42 = vld [vmem:[#allocation5 + $0xa0] ss:$8 sps:$4 sm:$0xff]   ;;  %v3710_v44 = vld [vmem:[#allocation5 + $0xb4] ss:$8 sps:$4 sm:$0xff]  }
  0x69   :  { %2748 = vmatpush1.bf16.msra.mxu0 %v3667_v15  ;;  %2503 = vmatprep.subr.bf16.mxu1 %v3668_v16  ;;  %v3709_v43 = vld [vmem:[#allocation5 + $0x6a0] ss:$8 sps:$4 sm:$0xff]   ;;  %v3712_v45 = vld [vmem:[#allocation5 + $0x6b4] ss:$8 sps:$4 sm:$0xff]   ;;  %v3714_v47 = vld [vmem:[#allocation5 + $0xb0] ss:$8 sps:$4 sm:$0xff]  }
  0x6a   :  { %2749 = vmatprep.subr.bf16.mxu0 %v3670_v17  ;;  %v83_v46 = vld [vmem:[#allocation2] sm:$0xff]  ;;  %v3715_v49 = vld [vmem:[#allocation5 + $0x6b0] ss:$8 sps:$4 sm:$0xff]   ;;  %v3722_v56 = vld [vmem:[#allocation5 + $0xd4] ss:$8 sps:$4 sm:$0xff]   ;;  %s4391_s4 = smov [#allocation11]  }
  0x6b   :  { %v3117_v48 = vcombine.high %v83_v46, %v83_v46  ;;  %v89_v50 = vld [vmem:[#allocation2 + $0x30] sm:$0xff]  ;;  %v3716_v51 = vld [vmem:[#allocation5 + $0xc4] ss:$8 sps:$4 sm:$0xff]   ;;  %v3720_v54 = vld [vmem:[#allocation5 + $0xc0] ss:$8 sps:$4 sm:$0xff]   ;;  %v3116_v6 = vcombine.low %v83_v46, %v83_v46  ;;  %s3105_s26 = sshll.u32 %s4391_s4, 4  ;;  %s3106_s26 = int_to_ptr.vmem [resolvable:$true] %s3105_s26 }
  0x6c   :  { %2504 = vmatpush1.bf16.msra.mxu1 %v3672_v18  ;;  %v3718_v52 = vld [vmem:[#allocation5 + $0x6c4] ss:$8 sps:$4 sm:$0xff]   ;;  %v3129_v53 = vcombine.high %v89_v50, %v89_v50  ;;  %v3721_v55 = vld [vmem:[#allocation5 + $0x6c0] ss:$8 sps:$4 sm:$0xff]   ;;  %v3724_v57 = vld [vmem:[#allocation5 + $0x6d4] ss:$8 sps:$4 sm:$0xff]   ;;  %v3128_v7 = vcombine.low %v89_v50, %v89_v50  ;;  %p4359_p13 = scmp.lt.s32.totalorder %s3106_s26, %s3106_s26 }
  0x6d   :  { %2750 = vmatpush1.bf16.msra.mxu0 %v3673_v19  ;;  %2505 = vmatprep.subr.bf16.mxu1 %v3674_v20  ;;  %v3726_v58 = vld [vmem:[#allocation5 + $0xd0] ss:$8 sps:$4 sm:$0xff]   ;;  %v3728_v60 = vld [vmem:[#allocation5 + $0xe4] ss:$8 sps:$4 sm:$0xff]   ;;  %v3732_v62 = vld [vmem:[#allocation5 + $0xe0] ss:$8 sps:$4 sm:$0xff]  }
  0x6e   :  { %2751 = vmatprep.subr.bf16.mxu0 %v3676_v21  ;;  %2527 = vmatprep.mubr.bf16.mxu1 %v3117_v48  ;;  %v3727_v59 = vld [vmem:[#allocation5 + $0x6d0] ss:$8 sps:$4 sm:$0xff]   ;;  %v3730_v61 = vld [vmem:[#allocation5 + $0x6e4] ss:$8 sps:$4 sm:$0xff]   ;;  %v3733_v63 = vld [vmem:[#allocation5 + $0x6e0] ss:$8 sps:$4 sm:$0xff]  }
  0x6f   :  { %2773 = vmatprep.mubr.bf16.mxu0 %v3129_v53  ;;  %v3734_v0 = vld [vmem:[#allocation5 + $0xf4] ss:$8 sps:$4 sm:$0xff]   ;;  %v3738_v2 = vld [vmem:[#allocation5 + $0xf0] ss:$8 sps:$4 sm:$0xff]   ;;  %v3744_v4 = vld [vmem:[#allocation5 + $0x104] ss:$8 sps:$4 sm:$0xff]  }
  0x70   :  { %2506 = vmatpush1.bf16.msra.mxu1 %v3678_v22  ;;  %v3736_v1 = vld [vmem:[#allocation5 + $0x6f4] ss:$8 sps:$4 sm:$0xff]   ;;  %v3739_v3 = vld [vmem:[#allocation5 + $0x6f0] ss:$8 sps:$4 sm:$0xff]   ;;  %v3749_v5 = vld [vmem:[#allocation5 + $0x704] ss:$8 sps:$4 sm:$0xff]  }
  0x71   :  { %2752 = vmatpush1.bf16.msra.mxu0 %v3679_v23  ;;  %2507 = vmatprep.subr.bf16.mxu1 %v3680_v24  ;;  %v3742_v8 = vld [vmem:[#allocation5 + $0x100] ss:$8 sps:$4 sm:$0xff]   ;;  %v3752_v10 = vld [vmem:[#allocation5 + $0x114] ss:$8 sps:$4 sm:$0xff]   ;;  %v3750_v12 = vld [vmem:[#allocation5 + $0x110] ss:$8 sps:$4 sm:$0xff]  }
  0x72   :  { %2753 = vmatprep.subr.bf16.mxu0 %v3682_v25  ;;  %v3747_v9 = vld [vmem:[#allocation5 + $0x700] ss:$8 sps:$4 sm:$0xff]   ;;  %v3755_v11 = vld [vmem:[#allocation5 + $0x714] ss:$8 sps:$4 sm:$0xff]   ;;  %v3753_v13 = vld [vmem:[#allocation5 + $0x710] ss:$8 sps:$4 sm:$0xff]  }
  0x73   :  { %v3758_v14 = vld [vmem:[#allocation5 + $0x124] ss:$8 sps:$4 sm:$0xff]   ;;  %v3756_v16 = vld [vmem:[#allocation5 + $0x120] ss:$8 sps:$4 sm:$0xff]   ;;  %v3764_v18 = vld [vmem:[#allocation5 + $0x134] ss:$8 sps:$4 sm:$0xff]  }
  0x74   :  { %2508 = vmatpush1.bf16.msra.mxu1 %v3684_v26  ;;  %v3761_v15 = vld [vmem:[#allocation5 + $0x724] ss:$8 sps:$4 sm:$0xff]   ;;  %v3759_v17 = vld [vmem:[#allocation5 + $0x720] ss:$8 sps:$4 sm:$0xff]   ;;  %v3767_v19 = vld [vmem:[#allocation5 + $0x734] ss:$8 sps:$4 sm:$0xff]  }
  0x75   :  { %2754 = vmatpush1.bf16.msra.mxu0 %v3685_v27  ;;  %2509 = vmatprep.subr.bf16.mxu1 %v3686_v28  ;;  %v3762_v20 = vld [vmem:[#allocation5 + $0x130] ss:$8 sps:$4 sm:$0xff]   ;;  %v3770_v22 = vld [vmem:[#allocation5 + $0x144] ss:$8 sps:$4 sm:$0xff]   ;;  %v3768_v24 = vld [vmem:[#allocation5 + $0x140] ss:$8 sps:$4 sm:$0xff]  }
  0x76   :  { %2755 = vmatprep.subr.bf16.mxu0 %v3688_v29  ;;  %v3765_v21 = vld [vmem:[#allocation5 + $0x730] ss:$8 sps:$4 sm:$0xff]   ;;  %v3773_v23 = vld [vmem:[#allocation5 + $0x744] ss:$8 sps:$4 sm:$0xff]   ;;  %v3771_v25 = vld [vmem:[#allocation5 + $0x740] ss:$8 sps:$4 sm:$0xff]  }
  0x77   :  { %v3776_v26 = vld [vmem:[#allocation5 + $0x154] ss:$8 sps:$4 sm:$0xff]   ;;  %v3774_v28 = vld [vmem:[#allocation5 + $0x150] ss:$8 sps:$4 sm:$0xff]   ;;  %v3806_v50 = vld [vmem:[#allocation5 + $0x1a4] ss:$8 sps:$4 sm:$0xff]  }
  0x78   :  { %2510 = vmatpush1.bf16.msra.mxu1 %v3690_v30  ;;  %v3779_v27 = vld [vmem:[#allocation5 + $0x754] ss:$8 sps:$4 sm:$0xff]   ;;  %v3777_v29 = vld [vmem:[#allocation5 + $0x750] ss:$8 sps:$4 sm:$0xff]   ;;  %v3782_v30 = vld [vmem:[#allocation5 + $0x164] ss:$8 sps:$4 sm:$0xff]  }
  0x79   :  { %2756 = vmatpush1.bf16.msra.mxu0 %v3691_v31  ;;  %2511 = vmatprep.subr.bf16.mxu1 %v3692_v32  ;;  %v3785_v31 = vld [vmem:[#allocation5 + $0x764] ss:$8 sps:$4 sm:$0xff]   ;;  %v3800_v46 = vld [vmem:[#allocation5 + $0x194] ss:$8 sps:$4 sm:$0xff]   ;;  %v3798_v48 = vld [vmem:[#allocation5 + $0x190] ss:$8 sps:$4 sm:$0xff]  }
  0x7a   :  { %2757 = vmatprep.subr.bf16.mxu0 %v3694_v33  ;;  %v4482_v32 = vld [vmem:[#allocation2 + $0x8] sm:$0xff]  ;;  %s4354_s27 = scalar_lea.vmem %s3106_s26, 128 }
  0x7b   :  { %v3780_v33 = vld [vmem:[#allocation5 + $0x160] ss:$8 sps:$4 sm:$0xff]   ;;  %p4355_p12 = scmp.ne.s32.totalorder %s3106_s26, %s4354_s27  ;;  %p4360_p0 = scmp.lt.s32.totalorder %s4354_s27, %s4354_s27 }
  0x7c   :  { %2512 = vmatpush1.bf16.msra.mxu1 %v3696_v34  ;;  %v3783_v34 = vld [vmem:[#allocation5 + $0x760] ss:$8 sps:$4 sm:$0xff]  }
  0x7d   :  { %2758 = vmatpush1.bf16.msra.mxu0 %v3697_v35  ;;  %2513 = vmatprep.subr.bf16.mxu1 %v3698_v36  ;;  %v3119_v35 = vcombine.high %v4482_v32, %v4482_v32  ;;  %v4486_v36 = vld [vmem:[#allocation2 + $0x38] sm:$0xff]  ;;  %v3807_v53 = vld [vmem:[#allocation5 + $0x7a0] ss:$8 sps:$4 sm:$0xff]   ;;  %p4361_p1 = por %p4360_p0, %p4359_p13 }
  0x7e   :  { %2759 = vmatprep.subr.bf16.mxu0 %v3700_v37  ;;  %v3788_v37 = vld [vmem:[#allocation5 + $0x174] ss:$8 sps:$4 sm:$0xff]  }
  0x7f   :  { %p4362_p2 = pnand %p4361_p1, %p4355_p12 }
  0x80   :  { %2514 = vmatpush1.bf16.msra.mxu1 %v3702_v38  ;;  %v3131_v38 = vcombine.high %v4486_v36, %v4486_v36 }
  0x81   :  { %2760 = vmatpush1.bf16.msra.mxu0 %v3703_v39  ;;  %2515 = vmatprep.subr.bf16.mxu1 %v3704_v40  ;;  %v3791_v39 = vld [vmem:[#allocation5 + $0x774] ss:$8 sps:$4 sm:$0xff]   ;;  %v3786_v40 = vld [vmem:[#allocation5 + $0x170] ss:$8 sps:$4 sm:$0xff]  }
  0x82   :  { %2761 = vmatprep.subr.bf16.mxu0 %v3706_v41  ;;  %v3789_v41 = vld [vmem:[#allocation5 + $0x770] ss:$8 sps:$4 sm:$0xff]  }
  0x84   :  { %2516 = vmatpush1.bf16.msra.mxu1 %v3708_v42  ;;  %v3794_v42 = vld [vmem:[#allocation5 + $0x184] ss:$8 sps:$4 sm:$0xff]  }
  0x85   :  { %2762 = vmatpush1.bf16.msra.mxu0 %v3709_v43  ;;  %2517 = vmatprep.subr.bf16.mxu1 %v3710_v44  ;;  %v3797_v43 = vld [vmem:[#allocation5 + $0x784] ss:$8 sps:$4 sm:$0xff]   ;;  %v3792_v44 = vld [vmem:[#allocation5 + $0x180] ss:$8 sps:$4 sm:$0xff]  }
  0x86   :  { %2763 = vmatprep.subr.bf16.mxu0 %v3712_v45  ;;  %v3795_v45 = vld [vmem:[#allocation5 + $0x780] ss:$8 sps:$4 sm:$0xff]  }
  0x88   :  { %2518 = vmatpush1.bf16.msra.mxu1 %v3714_v47  ;;  %v3803_v47 = vld [vmem:[#allocation5 + $0x794] ss:$8 sps:$4 sm:$0xff]  }
  0x89   :  { %2764 = vmatpush1.bf16.msra.mxu0 %v3715_v49  ;;  %2519 = vmatprep.subr.bf16.mxu1 %v3716_v51  ;;  %v3801_v49 = vld [vmem:[#allocation5 + $0x790] ss:$8 sps:$4 sm:$0xff]   ;;  %v3809_v51 = vld [vmem:[#allocation5 + $0x7a4] ss:$8 sps:$4 sm:$0xff]  }
  0x8a   :  { %2765 = vmatprep.subr.bf16.mxu0 %v3718_v52  ;;  %v3804_v52 = vld [vmem:[#allocation5 + $0x1a0] ss:$8 sps:$4 sm:$0xff]  }
  0x8c   :  { %2520 = vmatpush1.bf16.msra.mxu1 %v3720_v54  ;;  %v3812_v54 = vld [vmem:[#allocation5 + $0x1b4] ss:$8 sps:$4 sm:$0xff]  }
  0x8d   :  { %2766 = vmatpush1.bf16.msra.mxu0 %v3721_v55  ;;  %2521 = vmatprep.subr.bf16.mxu1 %v3722_v56  ;;  %v3815_v55 = vld [vmem:[#allocation5 + $0x7b4] ss:$8 sps:$4 sm:$0xff]   ;;  %v3810_v56 = vld [vmem:[#allocation5 + $0x1b0] ss:$8 sps:$4 sm:$0xff]  }
  0x8e   :  { %2767 = vmatprep.subr.bf16.mxu0 %v3724_v57  ;;  %v3813_v57 = vld [vmem:[#allocation5 + $0x7b0] ss:$8 sps:$4 sm:$0xff]  }
  0x90   :  { %2522 = vmatpush1.bf16.msra.mxu1 %v3726_v58  ;;  %v3818_v58 = vld [vmem:[#allocation5 + $0x1c4] ss:$8 sps:$4 sm:$0xff]  }
  0x91   :  { %2768 = vmatpush1.bf16.msra.mxu0 %v3727_v59  ;;  %2523 = vmatprep.subr.bf16.mxu1 %v3728_v60  ;;  %v3821_v59 = vld [vmem:[#allocation5 + $0x7c4] ss:$8 sps:$4 sm:$0xff]   ;;  %v3816_v60 = vld [vmem:[#allocation5 + $0x1c0] ss:$8 sps:$4 sm:$0xff]  }
  0x92   :  { %2769 = vmatprep.subr.bf16.mxu0 %v3730_v61  ;;  %v3819_v61 = vld [vmem:[#allocation5 + $0x7c0] ss:$8 sps:$4 sm:$0xff]  }
  0x94   :  { %2524 = vmatpush1.bf16.msra.mxu1 %v3732_v62  ;;  %v3824_v62 = vld [vmem:[#allocation5 + $0x1d4] ss:$8 sps:$4 sm:$0xff]  }
  0x95   :  { %2770 = vmatpush1.bf16.msra.mxu0 %v3733_v63  ;;  %2525 = vmatprep.subr.bf16.mxu1 %v3734_v0  ;;  %v3827_v63 = vld [vmem:[#allocation5 + $0x7d4] ss:$8 sps:$4 sm:$0xff]   ;;  %v3822_v0 = vld [vmem:[#allocation5 + $0x1d0] ss:$8 sps:$4 sm:$0xff]  }
  0x96   :  { %2771 = vmatprep.subr.bf16.mxu0 %v3736_v1  ;;  %v3825_v1 = vld [vmem:[#allocation5 + $0x7d0] ss:$8 sps:$4 sm:$0xff]  }
  0x98   :  { %2526 = vmatpush1.bf16.msra.mxu1 %v3738_v2  ;;  %v3830_v2 = vld [vmem:[#allocation5 + $0x1e4] ss:$8 sps:$4 sm:$0xff]  }
  0x99   :  { %2772 = vmatpush1.bf16.msra.mxu0 %v3739_v3  ;;  %2536 = vmatprep.subr.bf16.mxu1 %v3744_v4  ;;  %v3833_v3 = vld [vmem:[#allocation5 + $0x7e4] ss:$8 sps:$4 sm:$0xff]   ;;  %v3828_v4 = vld [vmem:[#allocation5 + $0x1e0] ss:$8 sps:$4 sm:$0xff]  }
  0x9a   :  { %2782 = vmatprep.subr.bf16.mxu0 %v3749_v5  ;;  %v3831_v5 = vld [vmem:[#allocation5 + $0x7e0] ss:$8 sps:$4 sm:$0xff]  }
  0x9b   :  { %2528 = vmatmul.mubr.bf16.vlgmr.msra.gmra.mrb[0].mxu1 %v3116_v6  ;;  %v3836_v6 = vld [vmem:[#allocation5 + $0x1f4] ss:$8 sps:$4 sm:$0xff]  }
  0x9c   :  { %2774 = vmatmul.mubr.bf16.vlgmr.msra.gmra.mrb[0].mxu0 %v3128_v7  ;;  %2537 = vmatpush1.bf16.msra.mxu1 %v3742_v8  ;;  %v3839_v7 = vld [vmem:[#allocation5 + $0x7f4] ss:$8 sps:$4 sm:$0xff]   ;;  %v3834_v8 = vld [vmem:[#allocation5 + $0x1f0] ss:$8 sps:$4 sm:$0xff]  }
  0x9d   :  { %2783 = vmatpush1.bf16.msra.mxu0 %v3747_v9  ;;  %2538 = vmatprep.subr.bf16.mxu1 %v3752_v10  ;;  %v3837_v9 = vld [vmem:[#allocation5 + $0x7f0] ss:$8 sps:$4 sm:$0xff]   ;;  %v3844_v10 = vld [vmem:[#allocation5 + $0x204] ss:$8 sps:$4 sm:$0xff]  }
  0x9e   :  { %2784 = vmatprep.subr.bf16.mxu0 %v3755_v11  ;;  %2568 = vmatprep.mubr.bf16.mxu1 %v3119_v35  ;;  %v3849_v11 = vld [vmem:[#allocation5 + $0x804] ss:$8 sps:$4 sm:$0xff]   ;;  %v3871_v35 = vld [vmem:[#allocation5 + $0x840] ss:$8 sps:$4 sm:$0xff]  }
  0x9f   :  { %2814 = vmatprep.mubr.bf16.mxu0 %v3131_v38  ;;  %v3874_v38 = vld [vmem:[#allocation5 + $0x250] ss:$8 sps:$4 sm:$0xff]  }
  0xa0   :  { %2539 = vmatpush1.bf16.msra.mxu1 %v3750_v12  ;;  %v3118_v12 = vcombine.low %v4482_v32, %v4482_v32  ;;  %v3870_v32 = vld [vmem:[#allocation5 + $0x244] ss:$8 sps:$4 sm:$0xff]  }
  0xa1   :  { %2785 = vmatpush1.bf16.msra.mxu0 %v3753_v13  ;;  %2540 = vmatprep.subr.bf16.mxu1 %v3758_v14  ;;  %v3842_v13 = vld [vmem:[#allocation5 + $0x200] ss:$8 sps:$4 sm:$0xff]   ;;  %v3130_v14 = vcombine.low %v4486_v36, %v4486_v36  ;;  %v3876_v36 = vld [vmem:[#allocation5 + $0x254] ss:$8 sps:$4 sm:$0xff]  }
  0xa2   :  { %2786 = vmatprep.subr.bf16.mxu0 %v3761_v15  ;;  %v3847_v15 = vld [vmem:[#allocation5 + $0x800] ss:$8 sps:$4 sm:$0xff]  }
  0xa4   :  { %2541 = vmatpush1.bf16.msra.mxu1 %v3756_v16  ;;  %v3852_v16 = vld [vmem:[#allocation5 + $0x214] ss:$8 sps:$4 sm:$0xff]  }
  0xa5   :  { %2787 = vmatpush1.bf16.msra.mxu0 %v3759_v17  ;;  %2542 = vmatprep.subr.bf16.mxu1 %v3764_v18  ;;  %v3855_v17 = vld [vmem:[#allocation5 + $0x814] ss:$8 sps:$4 sm:$0xff]  }
  0xa6   :  { %2788 = vmatprep.subr.bf16.mxu0 %v3767_v19  ;;  %v4494_v18 = vld [vmem:[#allocation2 + $0x10] sm:$0xff] }
  0xa7   :  { %v3121_v19 = vcombine.high %v4494_v18, %v4494_v18 }
  0xa8   :  { %2543 = vmatpush1.bf16.msra.mxu1 %v3762_v20  ;;  %v4498_v20 = vld [vmem:[#allocation2 + $0x40] sm:$0xff] }
  0xa9   :  { %2789 = vmatpush1.bf16.msra.mxu0 %v3765_v21  ;;  %2544 = vmatprep.subr.bf16.mxu1 %v3770_v22  ;;  %v3850_v21 = vld [vmem:[#allocation5 + $0x210] ss:$8 sps:$4 sm:$0xff]  }
  0xaa   :  { %2790 = vmatprep.subr.bf16.mxu0 %v3773_v23  ;;  %v3853_v22 = vld [vmem:[#allocation5 + $0x810] ss:$8 sps:$4 sm:$0xff]   ;;  %v3133_v23 = vcombine.high %v4498_v20, %v4498_v20 }
  0xac   :  { %2545 = vmatpush1.bf16.msra.mxu1 %v3768_v24  ;;  %v3858_v24 = vld [vmem:[#allocation5 + $0x224] ss:$8 sps:$4 sm:$0xff]  }
  0xad   :  { %2791 = vmatpush1.bf16.msra.mxu0 %v3771_v25  ;;  %2546 = vmatprep.subr.bf16.mxu1 %v3776_v26  ;;  %v3861_v25 = vld [vmem:[#allocation5 + $0x824] ss:$8 sps:$4 sm:$0xff]   ;;  %v3856_v26 = vld [vmem:[#allocation5 + $0x220] ss:$8 sps:$4 sm:$0xff]  }
  0xae   :  { %2792 = vmatprep.subr.bf16.mxu0 %v3779_v27  ;;  %v3859_v27 = vld [vmem:[#allocation5 + $0x820] ss:$8 sps:$4 sm:$0xff]  }
  0xb0   :  { %2547 = vmatpush1.bf16.msra.mxu1 %v3774_v28  ;;  %v3864_v28 = vld [vmem:[#allocation5 + $0x234] ss:$8 sps:$4 sm:$0xff]  }
  0xb1   :  { %2793 = vmatpush1.bf16.msra.mxu0 %v3777_v29  ;;  %2548 = vmatprep.subr.bf16.mxu1 %v3782_v30  ;;  %v3867_v29 = vld [vmem:[#allocation5 + $0x834] ss:$8 sps:$4 sm:$0xff]   ;;  %v3862_v30 = vld [vmem:[#allocation5 + $0x230] ss:$8 sps:$4 sm:$0xff]  }
  0xb2   :  { %2794 = vmatprep.subr.bf16.mxu0 %v3785_v31  ;;  %v3865_v31 = vld [vmem:[#allocation5 + $0x830] ss:$8 sps:$4 sm:$0xff]  }
  0xb4   :  { %2549 = vmatpush1.bf16.msra.mxu1 %v3780_v33  ;;  %v3873_v33 = vld [vmem:[#allocation5 + $0x844] ss:$8 sps:$4 sm:$0xff]  }
  0xb5   :  { %2795 = vmatpush1.bf16.msra.mxu0 %v3783_v34  ;;  %2550 = vmatprep.subr.bf16.mxu1 %v3788_v37  ;;  %v3868_v34 = vld [vmem:[#allocation5 + $0x240] ss:$8 sps:$4 sm:$0xff]   ;;  %v3879_v37 = vld [vmem:[#allocation5 + $0x854] ss:$8 sps:$4 sm:$0xff]  }
  0xb6   :  { %2796 = vmatprep.subr.bf16.mxu0 %v3791_v39  ;;  %v3877_v39 = vld [vmem:[#allocation5 + $0x850] ss:$8 sps:$4 sm:$0xff]  }
  0xb8   :  { %2551 = vmatpush1.bf16.msra.mxu1 %v3786_v40  ;;  %v3882_v40 = vld [vmem:[#allocation5 + $0x264] ss:$8 sps:$4 sm:$0xff]  }
  0xb9   :  { %2797 = vmatpush1.bf16.msra.mxu0 %v3789_v41  ;;  %2552 = vmatprep.subr.bf16.mxu1 %v3794_v42  ;;  %v3885_v41 = vld [vmem:[#allocation5 + $0x864] ss:$8 sps:$4 sm:$0xff]   ;;  %v3880_v42 = vld [vmem:[#allocation5 + $0x260] ss:$8 sps:$4 sm:$0xff]  }
  0xba   :  { %2798 = vmatprep.subr.bf16.mxu0 %v3797_v43  ;;  %v3883_v43 = vld [vmem:[#allocation5 + $0x860] ss:$8 sps:$4 sm:$0xff]  }
  0xbc   :  { %2553 = vmatpush1.bf16.msra.mxu1 %v3792_v44  ;;  %v3888_v44 = vld [vmem:[#allocation5 + $0x274] ss:$8 sps:$4 sm:$0xff]  }
  0xbd   :  { %2799 = vmatpush1.bf16.msra.mxu0 %v3795_v45  ;;  %2554 = vmatprep.subr.bf16.mxu1 %v3800_v46  ;;  %v3891_v45 = vld [vmem:[#allocation5 + $0x874] ss:$8 sps:$4 sm:$0xff]   ;;  %v3886_v46 = vld [vmem:[#allocation5 + $0x270] ss:$8 sps:$4 sm:$0xff]  }
  0xbe   :  { %2800 = vmatprep.subr.bf16.mxu0 %v3803_v47  ;;  %v3889_v47 = vld [vmem:[#allocation5 + $0x870] ss:$8 sps:$4 sm:$0xff]  }
  0xc0   :  { %2555 = vmatpush1.bf16.msra.mxu1 %v3798_v48  ;;  %v3894_v48 = vld [vmem:[#allocation5 + $0x284] ss:$8 sps:$4 sm:$0xff]  }
  0xc1   :  { %2801 = vmatpush1.bf16.msra.mxu0 %v3801_v49  ;;  %2556 = vmatprep.subr.bf16.mxu1 %v3806_v50  ;;  %v3897_v49 = vld [vmem:[#allocation5 + $0x884] ss:$8 sps:$4 sm:$0xff]   ;;  %v3892_v50 = vld [vmem:[#allocation5 + $0x280] ss:$8 sps:$4 sm:$0xff]  }
  0xc2   :  { %2802 = vmatprep.subr.bf16.mxu0 %v3809_v51  ;;  %v3895_v51 = vld [vmem:[#allocation5 + $0x880] ss:$8 sps:$4 sm:$0xff]  }
  0xc4   :  { %2557 = vmatpush1.bf16.msra.mxu1 %v3804_v52  ;;  %v3900_v52 = vld [vmem:[#allocation5 + $0x294] ss:$8 sps:$4 sm:$0xff]  }
  0xc5   :  { %2803 = vmatpush1.bf16.msra.mxu0 %v3807_v53  ;;  %2558 = vmatprep.subr.bf16.mxu1 %v3812_v54  ;;  %v3903_v53 = vld [vmem:[#allocation5 + $0x894] ss:$8 sps:$4 sm:$0xff]   ;;  %v3898_v54 = vld [vmem:[#allocation5 + $0x290] ss:$8 sps:$4 sm:$0xff]  }
  0xc6   :  { %2804 = vmatprep.subr.bf16.mxu0 %v3815_v55  ;;  %v3901_v55 = vld [vmem:[#allocation5 + $0x890] ss:$8 sps:$4 sm:$0xff]  }
  0xc8   :  { %2559 = vmatpush1.bf16.msra.mxu1 %v3810_v56  ;;  %v3906_v56 = vld [vmem:[#allocation5 + $0x2a4] ss:$8 sps:$4 sm:$0xff]  }
  0xc9   :  { %2805 = vmatpush1.bf16.msra.mxu0 %v3813_v57  ;;  %2560 = vmatprep.subr.bf16.mxu1 %v3818_v58  ;;  %v3909_v57 = vld [vmem:[#allocation5 + $0x8a4] ss:$8 sps:$4 sm:$0xff]   ;;  %v3904_v58 = vld [vmem:[#allocation5 + $0x2a0] ss:$8 sps:$4 sm:$0xff]  }
  0xca   :  { %2806 = vmatprep.subr.bf16.mxu0 %v3821_v59  ;;  %v3907_v59 = vld [vmem:[#allocation5 + $0x8a0] ss:$8 sps:$4 sm:$0xff]  }
  0xcc   :  { %2561 = vmatpush1.bf16.msra.mxu1 %v3816_v60  ;;  %v3912_v60 = vld [vmem:[#allocation5 + $0x2b4] ss:$8 sps:$4 sm:$0xff]  }
  0xcd   :  { %2807 = vmatpush1.bf16.msra.mxu0 %v3819_v61  ;;  %2562 = vmatprep.subr.bf16.mxu1 %v3824_v62  ;;  %v3915_v61 = vld [vmem:[#allocation5 + $0x8b4] ss:$8 sps:$4 sm:$0xff]   ;;  %v3910_v62 = vld [vmem:[#allocation5 + $0x2b0] ss:$8 sps:$4 sm:$0xff]  }
  0xce   :  { %2808 = vmatprep.subr.bf16.mxu0 %v3827_v63  ;;  %v3913_v63 = vld [vmem:[#allocation5 + $0x8b0] ss:$8 sps:$4 sm:$0xff]  }
  0xd0   :  { %2563 = vmatpush1.bf16.msra.mxu1 %v3822_v0  ;;  %v3918_v0 = vld [vmem:[#allocation5 + $0x2c4] ss:$8 sps:$4 sm:$0xff]  }
  0xd1   :  { %2809 = vmatpush1.bf16.msra.mxu0 %v3825_v1  ;;  %2564 = vmatprep.subr.bf16.mxu1 %v3830_v2  ;;  %v3921_v1 = vld [vmem:[#allocation5 + $0x8c4] ss:$8 sps:$4 sm:$0xff]   ;;  %v3916_v2 = vld [vmem:[#allocation5 + $0x2c0] ss:$8 sps:$4 sm:$0xff]  }
  0xd2   :  { %2810 = vmatprep.subr.bf16.mxu0 %v3833_v3  ;;  %v3919_v3 = vld [vmem:[#allocation5 + $0x8c0] ss:$8 sps:$4 sm:$0xff]  }
  0xd4   :  { %2565 = vmatpush1.bf16.msra.mxu1 %v3828_v4  ;;  %v3924_v4 = vld [vmem:[#allocation5 + $0x2d4] ss:$8 sps:$4 sm:$0xff]  }
  0xd5   :  { %2811 = vmatpush1.bf16.msra.mxu0 %v3831_v5  ;;  %2566 = vmatprep.subr.bf16.mxu1 %v3836_v6  ;;  %v3927_v5 = vld [vmem:[#allocation5 + $0x8d4] ss:$8 sps:$4 sm:$0xff]   ;;  %v3922_v6 = vld [vmem:[#allocation5 + $0x2d0] ss:$8 sps:$4 sm:$0xff]  }
  0xd6   :  { %2812 = vmatprep.subr.bf16.mxu0 %v3839_v7  ;;  %v3925_v7 = vld [vmem:[#allocation5 + $0x8d0] ss:$8 sps:$4 sm:$0xff]  }
  0xd8   :  { %2567 = vmatpush1.bf16.msra.mxu1 %v3834_v8  ;;  %v3930_v8 = vld [vmem:[#allocation5 + $0x2e4] ss:$8 sps:$4 sm:$0xff]  }
  0xd9   :  { %2813 = vmatpush1.bf16.msra.mxu0 %v3837_v9  ;;  %2577 = vmatprep.subr.bf16.mxu1 %v3844_v10  ;;  %v3933_v9 = vld [vmem:[#allocation5 + $0x8e4] ss:$8 sps:$4 sm:$0xff]   ;;  %v3928_v10 = vld [vmem:[#allocation5 + $0x2e0] ss:$8 sps:$4 sm:$0xff]  }
  0xda   :  { %2823 = vmatprep.subr.bf16.mxu0 %v3849_v11  ;;  %v3931_v11 = vld [vmem:[#allocation5 + $0x8e0] ss:$8 sps:$4 sm:$0xff]  }
  0xdb   :  { %2569 = vmatmul.mubr.bf16.vlgmr.msra.gmra.mrb[0].mxu1 %v3118_v12  ;;  %v3936_v12 = vld [vmem:[#allocation5 + $0x2f4] ss:$8 sps:$4 sm:$0xff]  }
  0xdc   :  { %2815 = vmatmul.mubr.bf16.vlgmr.msra.gmra.mrb[0].mxu0 %v3130_v14  ;;  %2578 = vmatpush1.bf16.msra.mxu1 %v3842_v13  ;;  %v3939_v13 = vld [vmem:[#allocation5 + $0x8f4] ss:$8 sps:$4 sm:$0xff]   ;;  %v3934_v14 = vld [vmem:[#allocation5 + $0x2f0] ss:$8 sps:$4 sm:$0xff]  }
  0xdd   :  { %2824 = vmatpush1.bf16.msra.mxu0 %v3847_v15  ;;  %2579 = vmatprep.subr.bf16.mxu1 %v3852_v16  ;;  %v3937_v15 = vld [vmem:[#allocation5 + $0x8f0] ss:$8 sps:$4 sm:$0xff]   ;;  %v3944_v16 = vld [vmem:[#allocation5 + $0x304] ss:$8 sps:$4 sm:$0xff]  }
  0xde   :  { %2825 = vmatprep.subr.bf16.mxu0 %v3855_v17  ;;  %2609 = vmatprep.mubr.bf16.mxu1 %v3121_v19  ;;  %v3949_v17 = vld [vmem:[#allocation5 + $0x904] ss:$8 sps:$4 sm:$0xff]   ;;  %v3942_v19 = vld [vmem:[#allocation5 + $0x300] ss:$8 sps:$4 sm:$0xff]  }
  0xdf   :  { %2855 = vmatprep.mubr.bf16.mxu0 %v3133_v23  ;;  %v3132_v23 = vcombine.low %v4498_v20, %v4498_v20  ;;  %v3953_v20 = vld [vmem:[#allocation5 + $0x910] ss:$8 sps:$4 sm:$0xff]  }
  0xe0   :  { %2580 = vmatpush1.bf16.msra.mxu1 %v3850_v21  ;;  %v3947_v21 = vld [vmem:[#allocation5 + $0x900] ss:$8 sps:$4 sm:$0xff]  }
  0xe1   :  { %2826 = vmatpush1.bf16.msra.mxu0 %v3853_v22  ;;  %2581 = vmatprep.subr.bf16.mxu1 %v3858_v24  ;;  %v3120_v22 = vcombine.low %v4494_v18, %v4494_v18  ;;  %v4506_v24 = vld [vmem:[#allocation2 + $0x18] sm:$0xff] }
  0xe2   :  { %2827 = vmatprep.subr.bf16.mxu0 %v3861_v25  ;;  %v4508_v25 = vld [vmem:[#allocation2 + $0x48] sm:$0xff]  ;;  %v3950_v18 = vld [vmem:[#allocation5 + $0x310] ss:$8 sps:$4 sm:$0xff]  }
  0xe4   :  { %2582 = vmatpush1.bf16.msra.mxu1 %v3856_v26  ;;  %v3952_v26 = vld [vmem:[#allocation5 + $0x314] ss:$8 sps:$4 sm:$0xff]  }
  0xe5   :  { %2828 = vmatpush1.bf16.msra.mxu0 %v3859_v27  ;;  %2583 = vmatprep.subr.bf16.mxu1 %v3864_v28  ;;  %v3955_v27 = vld [vmem:[#allocation5 + $0x914] ss:$8 sps:$4 sm:$0xff]   ;;  %v3123_v28 = vcombine.high %v4506_v24, %v4506_v24 }
  0xe6   :  { %2829 = vmatprep.subr.bf16.mxu0 %v3867_v29  ;;  %v3135_v29 = vcombine.high %v4508_v25, %v4508_v25 }
  0xe8   :  { %2584 = vmatpush1.bf16.msra.mxu1 %v3862_v30  ;;  %v3958_v30 = vld [vmem:[#allocation5 + $0x324] ss:$8 sps:$4 sm:$0xff]  }
  0xe9   :  { %2830 = vmatpush1.bf16.msra.mxu0 %v3865_v31  ;;  %2585 = vmatprep.subr.bf16.mxu1 %v3870_v32  ;;  %v3961_v31 = vld [vmem:[#allocation5 + $0x924] ss:$8 sps:$4 sm:$0xff]   ;;  %v3956_v32 = vld [vmem:[#allocation5 + $0x320] ss:$8 sps:$4 sm:$0xff]  }
  0xea   :  { %2831 = vmatprep.subr.bf16.mxu0 %v3873_v33  ;;  %v3959_v33 = vld [vmem:[#allocation5 + $0x920] ss:$8 sps:$4 sm:$0xff]  }
  0xec   :  { %2586 = vmatpush1.bf16.msra.mxu1 %v3868_v34  ;;  %v3964_v34 = vld [vmem:[#allocation5 + $0x334] ss:$8 sps:$4 sm:$0xff]  }
  0xed   :  { %2832 = vmatpush1.bf16.msra.mxu0 %v3871_v35  ;;  %2587 = vmatprep.subr.bf16.mxu1 %v3876_v36  ;;  %v3967_v35 = vld [vmem:[#allocation5 + $0x934] ss:$8 sps:$4 sm:$0xff]   ;;  %v3962_v36 = vld [vmem:[#allocation5 + $0x330] ss:$8 sps:$4 sm:$0xff]  }
  0xee   :  { %2833 = vmatprep.subr.bf16.mxu0 %v3879_v37  ;;  %v3965_v37 = vld [vmem:[#allocation5 + $0x930] ss:$8 sps:$4 sm:$0xff]  }
  0xf0   :  { %2588 = vmatpush1.bf16.msra.mxu1 %v3874_v38  ;;  %v3970_v38 = vld [vmem:[#allocation5 + $0x344] ss:$8 sps:$4 sm:$0xff]  }
  0xf1   :  { %2834 = vmatpush1.bf16.msra.mxu0 %v3877_v39  ;;  %2589 = vmatprep.subr.bf16.mxu1 %v3882_v40  ;;  %v3973_v39 = vld [vmem:[#allocation5 + $0x944] ss:$8 sps:$4 sm:$0xff]   ;;  %v3968_v40 = vld [vmem:[#allocation5 + $0x340] ss:$8 sps:$4 sm:$0xff]  }
  0xf2   :  { %2835 = vmatprep.subr.bf16.mxu0 %v3885_v41  ;;  %v3971_v41 = vld [vmem:[#allocation5 + $0x940] ss:$8 sps:$4 sm:$0xff]  }
  0xf4   :  { %2590 = vmatpush1.bf16.msra.mxu1 %v3880_v42  ;;  %v3976_v42 = vld [vmem:[#allocation5 + $0x354] ss:$8 sps:$4 sm:$0xff]  }
  0xf5   :  { %2836 = vmatpush1.bf16.msra.mxu0 %v3883_v43  ;;  %2591 = vmatprep.subr.bf16.mxu1 %v3888_v44  ;;  %v3979_v43 = vld [vmem:[#allocation5 + $0x954] ss:$8 sps:$4 sm:$0xff]   ;;  %v3974_v44 = vld [vmem:[#allocation5 + $0x350] ss:$8 sps:$4 sm:$0xff]  }
  0xf6   :  { %2837 = vmatprep.subr.bf16.mxu0 %v3891_v45  ;;  %v3977_v45 = vld [vmem:[#allocation5 + $0x950] ss:$8 sps:$4 sm:$0xff]  }
  0xf8   :  { %2592 = vmatpush1.bf16.msra.mxu1 %v3886_v46  ;;  %v3982_v46 = vld [vmem:[#allocation5 + $0x364] ss:$8 sps:$4 sm:$0xff]  }
  0xf9   :  { %2838 = vmatpush1.bf16.msra.mxu0 %v3889_v47  ;;  %2593 = vmatprep.subr.bf16.mxu1 %v3894_v48  ;;  %v3985_v47 = vld [vmem:[#allocation5 + $0x964] ss:$8 sps:$4 sm:$0xff]   ;;  %v3980_v48 = vld [vmem:[#allocation5 + $0x360] ss:$8 sps:$4 sm:$0xff]  }
  0xfa   :  { %2839 = vmatprep.subr.bf16.mxu0 %v3897_v49  ;;  %v3983_v49 = vld [vmem:[#allocation5 + $0x960] ss:$8 sps:$4 sm:$0xff]  }
  0xfc   :  { %2594 = vmatpush1.bf16.msra.mxu1 %v3892_v50  ;;  %v3988_v50 = vld [vmem:[#allocation5 + $0x374] ss:$8 sps:$4 sm:$0xff]  }
  0xfd   :  { %2840 = vmatpush1.bf16.msra.mxu0 %v3895_v51  ;;  %2595 = vmatprep.subr.bf16.mxu1 %v3900_v52  ;;  %v3991_v51 = vld [vmem:[#allocation5 + $0x974] ss:$8 sps:$4 sm:$0xff]   ;;  %v3986_v52 = vld [vmem:[#allocation5 + $0x370] ss:$8 sps:$4 sm:$0xff]  }
  0xfe   :  { %2841 = vmatprep.subr.bf16.mxu0 %v3903_v53  ;;  %v3989_v53 = vld [vmem:[#allocation5 + $0x970] ss:$8 sps:$4 sm:$0xff]  }
 0x100   :  { %2596 = vmatpush1.bf16.msra.mxu1 %v3898_v54  ;;  %v3994_v54 = vld [vmem:[#allocation5 + $0x384] ss:$8 sps:$4 sm:$0xff]  }
 0x101   :  { %2842 = vmatpush1.bf16.msra.mxu0 %v3901_v55  ;;  %2597 = vmatprep.subr.bf16.mxu1 %v3906_v56  ;;  %v3997_v55 = vld [vmem:[#allocation5 + $0x984] ss:$8 sps:$4 sm:$0xff]   ;;  %v3992_v56 = vld [vmem:[#allocation5 + $0x380] ss:$8 sps:$4 sm:$0xff]  }
 0x102   :  { %2843 = vmatprep.subr.bf16.mxu0 %v3909_v57  ;;  %v3995_v57 = vld [vmem:[#allocation5 + $0x980] ss:$8 sps:$4 sm:$0xff]  }
 0x104   :  { %2598 = vmatpush1.bf16.msra.mxu1 %v3904_v58  ;;  %v4000_v58 = vld [vmem:[#allocation5 + $0x394] ss:$8 sps:$4 sm:$0xff]  }
 0x105   :  { %2844 = vmatpush1.bf16.msra.mxu0 %v3907_v59  ;;  %2599 = vmatprep.subr.bf16.mxu1 %v3912_v60  ;;  %v4003_v59 = vld [vmem:[#allocation5 + $0x994] ss:$8 sps:$4 sm:$0xff]   ;;  %v3998_v60 = vld [vmem:[#allocation5 + $0x390] ss:$8 sps:$4 sm:$0xff]  }
 0x106   :  { %2845 = vmatprep.subr.bf16.mxu0 %v3915_v61  ;;  %v4001_v61 = vld [vmem:[#allocation5 + $0x990] ss:$8 sps:$4 sm:$0xff]  }
 0x108   :  { %2600 = vmatpush1.bf16.msra.mxu1 %v3910_v62  ;;  %v4006_v62 = vld [vmem:[#allocation5 + $0x3a4] ss:$8 sps:$4 sm:$0xff]  }
 0x109   :  { %2846 = vmatpush1.bf16.msra.mxu0 %v3913_v63  ;;  %2601 = vmatprep.subr.bf16.mxu1 %v3918_v0  ;;  %v4009_v63 = vld [vmem:[#allocation5 + $0x9a4] ss:$8 sps:$4 sm:$0xff]   ;;  %v4004_v0 = vld [vmem:[#allocation5 + $0x3a0] ss:$8 sps:$4 sm:$0xff]  }
 0x10a   :  { %2847 = vmatprep.subr.bf16.mxu0 %v3921_v1  ;;  %v4007_v1 = vld [vmem:[#allocation5 + $0x9a0] ss:$8 sps:$4 sm:$0xff]  }
 0x10c   :  { %2602 = vmatpush1.bf16.msra.mxu1 %v3916_v2  ;;  %v4012_v2 = vld [vmem:[#allocation5 + $0x3b4] ss:$8 sps:$4 sm:$0xff]  }
 0x10d   :  { %2848 = vmatpush1.bf16.msra.mxu0 %v3919_v3  ;;  %2603 = vmatprep.subr.bf16.mxu1 %v3924_v4  ;;  %v4015_v3 = vld [vmem:[#allocation5 + $0x9b4] ss:$8 sps:$4 sm:$0xff]   ;;  %v4010_v4 = vld [vmem:[#allocation5 + $0x3b0] ss:$8 sps:$4 sm:$0xff]  }
 0x10e   :  { %2849 = vmatprep.subr.bf16.mxu0 %v3927_v5  ;;  %v4013_v5 = vld [vmem:[#allocation5 + $0x9b0] ss:$8 sps:$4 sm:$0xff]  }
 0x110   :  { %2604 = vmatpush1.bf16.msra.mxu1 %v3922_v6  ;;  %v4018_v6 = vld [vmem:[#allocation5 + $0x3c4] ss:$8 sps:$4 sm:$0xff]  }
 0x111   :  { %2850 = vmatpush1.bf16.msra.mxu0 %v3925_v7  ;;  %2605 = vmatprep.subr.bf16.mxu1 %v3930_v8  ;;  %v4021_v7 = vld [vmem:[#allocation5 + $0x9c4] ss:$8 sps:$4 sm:$0xff]   ;;  %v4016_v8 = vld [vmem:[#allocation5 + $0x3c0] ss:$8 sps:$4 sm:$0xff]  }
 0x112   :  { %2851 = vmatprep.subr.bf16.mxu0 %v3933_v9  ;;  %v4019_v9 = vld [vmem:[#allocation5 + $0x9c0] ss:$8 sps:$4 sm:$0xff]  }
 0x114   :  { %2606 = vmatpush1.bf16.msra.mxu1 %v3928_v10  ;;  %v4024_v10 = vld [vmem:[#allocation5 + $0x3d4] ss:$8 sps:$4 sm:$0xff]  }
 0x115   :  { %2852 = vmatpush1.bf16.msra.mxu0 %v3931_v11  ;;  %2607 = vmatprep.subr.bf16.mxu1 %v3936_v12  ;;  %v4027_v11 = vld [vmem:[#allocation5 + $0x9d4] ss:$8 sps:$4 sm:$0xff]   ;;  %v4022_v12 = vld [vmem:[#allocation5 + $0x3d0] ss:$8 sps:$4 sm:$0xff]  }
 0x116   :  { %2853 = vmatprep.subr.bf16.mxu0 %v3939_v13  ;;  %v4025_v13 = vld [vmem:[#allocation5 + $0x9d0] ss:$8 sps:$4 sm:$0xff]  }
 0x118   :  { %2608 = vmatpush1.bf16.msra.mxu1 %v3934_v14  ;;  %v4030_v14 = vld [vmem:[#allocation5 + $0x3e4] ss:$8 sps:$4 sm:$0xff]  }
 0x119   :  { %2854 = vmatpush1.bf16.msra.mxu0 %v3937_v15  ;;  %2618 = vmatprep.subr.bf16.mxu1 %v3944_v16  ;;  %v4033_v15 = vld [vmem:[#allocation5 + $0x9e4] ss:$8 sps:$4 sm:$0xff]   ;;  %v4028_v16 = vld [vmem:[#allocation5 + $0x3e0] ss:$8 sps:$4 sm:$0xff]  }
 0x11a   :  { %2864 = vmatprep.subr.bf16.mxu0 %v3949_v17  ;;  %v4031_v17 = vld [vmem:[#allocation5 + $0x9e0] ss:$8 sps:$4 sm:$0xff]  }
 0x11b   :  { %2610 = vmatmul.mubr.bf16.vlgmr.msra.gmra.mrb[0].mxu1 %v3120_v22  ;;  %v4034_v22 = vld [vmem:[#allocation5 + $0x3f0] ss:$8 sps:$4 sm:$0xff]  }
 0x11c   :  { %2856 = vmatmul.mubr.bf16.vlgmr.msra.gmra.mrb[0].mxu0 %v3132_v23  ;;  %2619 = vmatpush1.bf16.msra.mxu1 %v3942_v19  ;;  %v4036_v19 = vld [vmem:[#allocation5 + $0x3f4] ss:$8 sps:$4 sm:$0xff]   ;;  %v4037_v23 = vld [vmem:[#allocation5 + $0x9f0] ss:$8 sps:$4 sm:$0xff]  }
 0x11d   :  { %2865 = vmatpush1.bf16.msra.mxu0 %v3947_v21  ;;  %2620 = vmatprep.subr.bf16.mxu1 %v3952_v26  ;;  %v4039_v21 = vld [vmem:[#allocation5 + $0x9f4] ss:$8 sps:$4 sm:$0xff]   ;;  %v4044_v26 = vld [vmem:[#allocation5 + $0x404] ss:$8 sps:$4 sm:$0xff]  }
 0x11e   :  { %2866 = vmatprep.subr.bf16.mxu0 %v3955_v27  ;;  %2650 = vmatprep.mubr.bf16.mxu1 %v3123_v28  ;;  %v4049_v27 = vld [vmem:[#allocation5 + $0xa04] ss:$8 sps:$4 sm:$0xff]  }
 0x11f   :  { %2896 = vmatprep.mubr.bf16.mxu0 %v3135_v29  ;;  %v4514_v28 = vld [vmem:[#allocation2 + $0x20] sm:$0xff]  ;;  %v3122_v29 = vcombine.low %v4506_v24, %v4506_v24  ;;  %v4050_v24 = vld [vmem:[#allocation5 + $0x410] ss:$8 sps:$4 sm:$0xff]  }
 0x120   :  { %2621 = vmatpush1.bf16.msra.mxu1 %v3950_v18  ;;  %v3134_v18 = vcombine.low %v4508_v25, %v4508_v25  ;;  %v4053_v25 = vld [vmem:[#allocation5 + $0xa10] ss:$8 sps:$4 sm:$0xff]  }
 0x121   :  { %2867 = vmatpush1.bf16.msra.mxu0 %v3953_v20  ;;  %2622 = vmatprep.subr.bf16.mxu1 %v3958_v30  ;;  %v4520_v20 = vld [vmem:[#allocation2 + $0x50] sm:$0xff]  ;;  %v4042_v30 = vld [vmem:[#allocation5 + $0x400] ss:$8 sps:$4 sm:$0xff]  }
 0x122   :  { %2868 = vmatprep.subr.bf16.mxu0 %v3961_v31  ;;  %v4047_v31 = vld [vmem:[#allocation5 + $0xa00] ss:$8 sps:$4 sm:$0xff]  }
 0x124   :  { %2623 = vmatpush1.bf16.msra.mxu1 %v3956_v32  ;;  %v4052_v32 = vld [vmem:[#allocation5 + $0x414] ss:$8 sps:$4 sm:$0xff]  }
 0x125   :  { %2869 = vmatpush1.bf16.msra.mxu0 %v3959_v33  ;;  %2624 = vmatprep.subr.bf16.mxu1 %v3964_v34  ;;  %v4055_v33 = vld [vmem:[#allocation5 + $0xa14] ss:$8 sps:$4 sm:$0xff]   ;;  %v3125_v34 = vcombine.high %v4514_v28, %v4514_v28 }
 0x126   :  { %2870 = vmatprep.subr.bf16.mxu0 %v3967_v35  ;;  %v3137_v35 = vcombine.high %v4520_v20, %v4520_v20 }
 0x128   :  { %2625 = vmatpush1.bf16.msra.mxu1 %v3962_v36  ;;  %v4058_v36 = vld [vmem:[#allocation5 + $0x424] ss:$8 sps:$4 sm:$0xff]  }
 0x129   :  { %2871 = vmatpush1.bf16.msra.mxu0 %v3965_v37  ;;  %2626 = vmatprep.subr.bf16.mxu1 %v3970_v38  ;;  %v4061_v37 = vld [vmem:[#allocation5 + $0xa24] ss:$8 sps:$4 sm:$0xff]   ;;  %v4056_v38 = vld [vmem:[#allocation5 + $0x420] ss:$8 sps:$4 sm:$0xff]  }
 0x12a   :  { %2872 = vmatprep.subr.bf16.mxu0 %v3973_v39  ;;  %v4059_v39 = vld [vmem:[#allocation5 + $0xa20] ss:$8 sps:$4 sm:$0xff]  }
 0x12c   :  { %2627 = vmatpush1.bf16.msra.mxu1 %v3968_v40  ;;  %v4064_v40 = vld [vmem:[#allocation5 + $0x434] ss:$8 sps:$4 sm:$0xff]  }
 0x12d   :  { %2873 = vmatpush1.bf16.msra.mxu0 %v3971_v41  ;;  %2628 = vmatprep.subr.bf16.mxu1 %v3976_v42  ;;  %v4067_v41 = vld [vmem:[#allocation5 + $0xa34] ss:$8 sps:$4 sm:$0xff]   ;;  %v4062_v42 = vld [vmem:[#allocation5 + $0x430] ss:$8 sps:$4 sm:$0xff]  }
 0x12e   :  { %2874 = vmatprep.subr.bf16.mxu0 %v3979_v43  ;;  %v4065_v43 = vld [vmem:[#allocation5 + $0xa30] ss:$8 sps:$4 sm:$0xff]  }
 0x130   :  { %2629 = vmatpush1.bf16.msra.mxu1 %v3974_v44  ;;  %v4070_v44 = vld [vmem:[#allocation5 + $0x444] ss:$8 sps:$4 sm:$0xff]  }
 0x131   :  { %2875 = vmatpush1.bf16.msra.mxu0 %v3977_v45  ;;  %2630 = vmatprep.subr.bf16.mxu1 %v3982_v46  ;;  %v4073_v45 = vld [vmem:[#allocation5 + $0xa44] ss:$8 sps:$4 sm:$0xff]   ;;  %v4068_v46 = vld [vmem:[#allocation5 + $0x440] ss:$8 sps:$4 sm:$0xff]  }
 0x132   :  { %2876 = vmatprep.subr.bf16.mxu0 %v3985_v47  ;;  %v4071_v47 = vld [vmem:[#allocation5 + $0xa40] ss:$8 sps:$4 sm:$0xff]  }
 0x134   :  { %2631 = vmatpush1.bf16.msra.mxu1 %v3980_v48  ;;  %v4076_v48 = vld [vmem:[#allocation5 + $0x454] ss:$8 sps:$4 sm:$0xff]  }
 0x135   :  { %2877 = vmatpush1.bf16.msra.mxu0 %v3983_v49  ;;  %2632 = vmatprep.subr.bf16.mxu1 %v3988_v50  ;;  %v4079_v49 = vld [vmem:[#allocation5 + $0xa54] ss:$8 sps:$4 sm:$0xff]   ;;  %v4074_v50 = vld [vmem:[#allocation5 + $0x450] ss:$8 sps:$4 sm:$0xff]  }
 0x136   :  { %2878 = vmatprep.subr.bf16.mxu0 %v3991_v51  ;;  %v4077_v51 = vld [vmem:[#allocation5 + $0xa50] ss:$8 sps:$4 sm:$0xff]  }
 0x138   :  { %2633 = vmatpush1.bf16.msra.mxu1 %v3986_v52  ;;  %v4082_v52 = vld [vmem:[#allocation5 + $0x464] ss:$8 sps:$4 sm:$0xff]  }
 0x139   :  { %2879 = vmatpush1.bf16.msra.mxu0 %v3989_v53  ;;  %2634 = vmatprep.subr.bf16.mxu1 %v3994_v54  ;;  %v4085_v53 = vld [vmem:[#allocation5 + $0xa64] ss:$8 sps:$4 sm:$0xff]   ;;  %v4080_v54 = vld [vmem:[#allocation5 + $0x460] ss:$8 sps:$4 sm:$0xff]  }
 0x13a   :  { %2880 = vmatprep.subr.bf16.mxu0 %v3997_v55  ;;  %v4083_v55 = vld [vmem:[#allocation5 + $0xa60] ss:$8 sps:$4 sm:$0xff]  }
 0x13c   :  { %2635 = vmatpush1.bf16.msra.mxu1 %v3992_v56  ;;  %v4088_v56 = vld [vmem:[#allocation5 + $0x474] ss:$8 sps:$4 sm:$0xff]  }
 0x13d   :  { %2881 = vmatpush1.bf16.msra.mxu0 %v3995_v57  ;;  %2636 = vmatprep.subr.bf16.mxu1 %v4000_v58  ;;  %v4091_v57 = vld [vmem:[#allocation5 + $0xa74] ss:$8 sps:$4 sm:$0xff]   ;;  %v4086_v58 = vld [vmem:[#allocation5 + $0x470] ss:$8 sps:$4 sm:$0xff]  }
 0x13e   :  { %2882 = vmatprep.subr.bf16.mxu0 %v4003_v59  ;;  %v4089_v59 = vld [vmem:[#allocation5 + $0xa70] ss:$8 sps:$4 sm:$0xff]  }
 0x140   :  { %2637 = vmatpush1.bf16.msra.mxu1 %v3998_v60  ;;  %v4094_v60 = vld [vmem:[#allocation5 + $0x484] ss:$8 sps:$4 sm:$0xff]  }
 0x141   :  { %2883 = vmatpush1.bf16.msra.mxu0 %v4001_v61  ;;  %2638 = vmatprep.subr.bf16.mxu1 %v4006_v62  ;;  %v4097_v61 = vld [vmem:[#allocation5 + $0xa84] ss:$8 sps:$4 sm:$0xff]   ;;  %v4092_v62 = vld [vmem:[#allocation5 + $0x480] ss:$8 sps:$4 sm:$0xff]  }
 0x142   :  { %2884 = vmatprep.subr.bf16.mxu0 %v4009_v63  ;;  %v4095_v63 = vld [vmem:[#allocation5 + $0xa80] ss:$8 sps:$4 sm:$0xff]  }
 0x144   :  { %2639 = vmatpush1.bf16.msra.mxu1 %v4004_v0  ;;  %v4100_v0 = vld [vmem:[#allocation5 + $0x494] ss:$8 sps:$4 sm:$0xff]  }
 0x145   :  { %2885 = vmatpush1.bf16.msra.mxu0 %v4007_v1  ;;  %2640 = vmatprep.subr.bf16.mxu1 %v4012_v2  ;;  %v4103_v1 = vld [vmem:[#allocation5 + $0xa94] ss:$8 sps:$4 sm:$0xff]   ;;  %v4098_v2 = vld [vmem:[#allocation5 + $0x490] ss:$8 sps:$4 sm:$0xff]  }
 0x146   :  { %2886 = vmatprep.subr.bf16.mxu0 %v4015_v3  ;;  %v4101_v3 = vld [vmem:[#allocation5 + $0xa90] ss:$8 sps:$4 sm:$0xff]  }
 0x148   :  { %2641 = vmatpush1.bf16.msra.mxu1 %v4010_v4  ;;  %v4106_v4 = vld [vmem:[#allocation5 + $0x4a4] ss:$8 sps:$4 sm:$0xff]  }
 0x149   :  { %2887 = vmatpush1.bf16.msra.mxu0 %v4013_v5  ;;  %2642 = vmatprep.subr.bf16.mxu1 %v4018_v6  ;;  %v4109_v5 = vld [vmem:[#allocation5 + $0xaa4] ss:$8 sps:$4 sm:$0xff]   ;;  %v4104_v6 = vld [vmem:[#allocation5 + $0x4a0] ss:$8 sps:$4 sm:$0xff]  }
 0x14a   :  { %2888 = vmatprep.subr.bf16.mxu0 %v4021_v7  ;;  %v4107_v7 = vld [vmem:[#allocation5 + $0xaa0] ss:$8 sps:$4 sm:$0xff]  }
 0x14c   :  { %2643 = vmatpush1.bf16.msra.mxu1 %v4016_v8  ;;  %v4112_v8 = vld [vmem:[#allocation5 + $0x4b4] ss:$8 sps:$4 sm:$0xff]  }
 0x14d   :  { %2889 = vmatpush1.bf16.msra.mxu0 %v4019_v9  ;;  %2644 = vmatprep.subr.bf16.mxu1 %v4024_v10  ;;  %v4115_v9 = vld [vmem:[#allocation5 + $0xab4] ss:$8 sps:$4 sm:$0xff]   ;;  %v4110_v10 = vld [vmem:[#allocation5 + $0x4b0] ss:$8 sps:$4 sm:$0xff]  }
 0x14e   :  { %2890 = vmatprep.subr.bf16.mxu0 %v4027_v11  ;;  %v4113_v11 = vld [vmem:[#allocation5 + $0xab0] ss:$8 sps:$4 sm:$0xff]  }
 0x150   :  { %2645 = vmatpush1.bf16.msra.mxu1 %v4022_v12  ;;  %v4118_v12 = vld [vmem:[#allocation5 + $0x4c4] ss:$8 sps:$4 sm:$0xff]  }
 0x151   :  { %2891 = vmatpush1.bf16.msra.mxu0 %v4025_v13  ;;  %2646 = vmatprep.subr.bf16.mxu1 %v4030_v14  ;;  %v4121_v13 = vld [vmem:[#allocation5 + $0xac4] ss:$8 sps:$4 sm:$0xff]   ;;  %v4116_v14 = vld [vmem:[#allocation5 + $0x4c0] ss:$8 sps:$4 sm:$0xff]  }
 0x152   :  { %2892 = vmatprep.subr.bf16.mxu0 %v4033_v15  ;;  %v4119_v15 = vld [vmem:[#allocation5 + $0xac0] ss:$8 sps:$4 sm:$0xff]  }
 0x154   :  { %2647 = vmatpush1.bf16.msra.mxu1 %v4028_v16  ;;  %v4124_v16 = vld [vmem:[#allocation5 + $0x4d4] ss:$8 sps:$4 sm:$0xff]  }
 0x155   :  { %2893 = vmatpush1.bf16.msra.mxu0 %v4031_v17  ;;  %2648 = vmatprep.subr.bf16.mxu1 %v4036_v19  ;;  %v4127_v17 = vld [vmem:[#allocation5 + $0xad4] ss:$8 sps:$4 sm:$0xff]   ;;  %v4122_v19 = vld [vmem:[#allocation5 + $0x4d0] ss:$8 sps:$4 sm:$0xff]  }
 0x156   :  { %2894 = vmatprep.subr.bf16.mxu0 %v4039_v21  ;;  %v4125_v21 = vld [vmem:[#allocation5 + $0xad0] ss:$8 sps:$4 sm:$0xff]  }
 0x158   :  { %2649 = vmatpush1.bf16.msra.mxu1 %v4034_v22  ;;  %v4130_v22 = vld [vmem:[#allocation5 + $0x4e4] ss:$8 sps:$4 sm:$0xff]  }
 0x159   :  { %2895 = vmatpush1.bf16.msra.mxu0 %v4037_v23  ;;  %2659 = vmatprep.subr.bf16.mxu1 %v4044_v26  ;;  %v4133_v23 = vld [vmem:[#allocation5 + $0xae4] ss:$8 sps:$4 sm:$0xff]   ;;  %v4128_v26 = vld [vmem:[#allocation5 + $0x4e0] ss:$8 sps:$4 sm:$0xff]  }
 0x15a   :  { %2905 = vmatprep.subr.bf16.mxu0 %v4049_v27  ;;  %v4131_v27 = vld [vmem:[#allocation5 + $0xae0] ss:$8 sps:$4 sm:$0xff]  }
 0x15b   :  { %2651 = vmatmul.mubr.bf16.vlgmr.msra.gmra.mrb[0].mxu1 %v3122_v29  ;;  %v4136_v29 = vld [vmem:[#allocation5 + $0x4f4] ss:$8 sps:$4 sm:$0xff]  }
 0x15c   :  { %2897 = vmatmul.mubr.bf16.vlgmr.msra.gmra.mrb[0].mxu0 %v3134_v18  ;;  %2660 = vmatpush1.bf16.msra.mxu1 %v4042_v30  ;;  %v4139_v18 = vld [vmem:[#allocation5 + $0xaf4] ss:$8 sps:$4 sm:$0xff]   ;;  %v4134_v30 = vld [vmem:[#allocation5 + $0x4f0] ss:$8 sps:$4 sm:$0xff]  }
 0x15d   :  { %2906 = vmatpush1.bf16.msra.mxu0 %v4047_v31  ;;  %2661 = vmatprep.subr.bf16.mxu1 %v4052_v32  ;;  %v4137_v31 = vld [vmem:[#allocation5 + $0xaf0] ss:$8 sps:$4 sm:$0xff]   ;;  %v4144_v32 = vld [vmem:[#allocation5 + $0x504] ss:$8 sps:$4 sm:$0xff]  }
 0x15e   :  { %2907 = vmatprep.subr.bf16.mxu0 %v4055_v33  ;;  %2691 = vmatprep.mubr.bf16.mxu1 %v3125_v34  ;;  %v4149_v33 = vld [vmem:[#allocation5 + $0xb04] ss:$8 sps:$4 sm:$0xff]   ;;  %v3124_v34 = vcombine.low %v4514_v28, %v4514_v28 }
 0x15f   :  { %2937 = vmatprep.mubr.bf16.mxu0 %v3137_v35  ;;  %v3136_v35 = vcombine.low %v4520_v20, %v4520_v20  ;;  %v4150_v20 = vld [vmem:[#allocation5 + $0x510] ss:$8 sps:$4 sm:$0xff]  }
 0x160   :  { %2662 = vmatpush1.bf16.msra.mxu1 %v4050_v24  ;;  %v4530_v24 = vld [vmem:[#allocation2 + $0x28] sm:$0xff] }
 0x161   :  { %2908 = vmatpush1.bf16.msra.mxu0 %v4053_v25  ;;  %2663 = vmatprep.subr.bf16.mxu1 %v4058_v36  ;;  %v4532_v25 = vld [vmem:[#allocation2 + $0x58] sm:$0xff]  ;;  %v4142_v36 = vld [vmem:[#allocation5 + $0x500] ss:$8 sps:$4 sm:$0xff]  }
 0x162   :  { %2909 = vmatprep.subr.bf16.mxu0 %v4061_v37  ;;  %v4147_v37 = vld [vmem:[#allocation5 + $0xb00] ss:$8 sps:$4 sm:$0xff]   ;;  %v3139_v28 = vcombine.high %v4532_v25, %v4532_v25 }
 0x164   :  { %2664 = vmatpush1.bf16.msra.mxu1 %v4056_v38  ;;  %v4152_v38 = vld [vmem:[#allocation5 + $0x514] ss:$8 sps:$4 sm:$0xff]  }
 0x165   :  { %2910 = vmatpush1.bf16.msra.mxu0 %v4059_v39  ;;  %2665 = vmatprep.subr.bf16.mxu1 %v4064_v40  ;;  %v4155_v39 = vld [vmem:[#allocation5 + $0xb14] ss:$8 sps:$4 sm:$0xff]   ;;  %v3127_v40 = vcombine.high %v4530_v24, %v4530_v24 }
 0x166   :  { %2911 = vmatprep.subr.bf16.mxu0 %v4067_v41  ;;  %v4153_v41 = vld [vmem:[#allocation5 + $0xb10] ss:$8 sps:$4 sm:$0xff]  }
 0x168   :  { %2666 = vmatpush1.bf16.msra.mxu1 %v4062_v42  ;;  %v4158_v42 = vld [vmem:[#allocation5 + $0x524] ss:$8 sps:$4 sm:$0xff]  }
 0x169   :  { %2912 = vmatpush1.bf16.msra.mxu0 %v4065_v43  ;;  %2667 = vmatprep.subr.bf16.mxu1 %v4070_v44  ;;  %v4161_v43 = vld [vmem:[#allocation5 + $0xb24] ss:$8 sps:$4 sm:$0xff]   ;;  %v4156_v44 = vld [vmem:[#allocation5 + $0x520] ss:$8 sps:$4 sm:$0xff]  }
 0x16a   :  { %2913 = vmatprep.subr.bf16.mxu0 %v4073_v45  ;;  %v4159_v45 = vld [vmem:[#allocation5 + $0xb20] ss:$8 sps:$4 sm:$0xff]  }
 0x16c   :  { %2668 = vmatpush1.bf16.msra.mxu1 %v4068_v46  ;;  %v4164_v46 = vld [vmem:[#allocation5 + $0x534] ss:$8 sps:$4 sm:$0xff]  }
 0x16d   :  { %2914 = vmatpush1.bf16.msra.mxu0 %v4071_v47  ;;  %2669 = vmatprep.subr.bf16.mxu1 %v4076_v48  ;;  %v4167_v47 = vld [vmem:[#allocation5 + $0xb34] ss:$8 sps:$4 sm:$0xff]   ;;  %v4162_v48 = vld [vmem:[#allocation5 + $0x530] ss:$8 sps:$4 sm:$0xff]  }
 0x16e   :  { %2915 = vmatprep.subr.bf16.mxu0 %v4079_v49  ;;  %v4165_v49 = vld [vmem:[#allocation5 + $0xb30] ss:$8 sps:$4 sm:$0xff]  }
 0x170   :  { %2670 = vmatpush1.bf16.msra.mxu1 %v4074_v50  ;;  %v4170_v50 = vld [vmem:[#allocation5 + $0x544] ss:$8 sps:$4 sm:$0xff]  }
 0x171   :  { %2916 = vmatpush1.bf16.msra.mxu0 %v4077_v51  ;;  %2671 = vmatprep.subr.bf16.mxu1 %v4082_v52  ;;  %v4173_v51 = vld [vmem:[#allocation5 + $0xb44] ss:$8 sps:$4 sm:$0xff]   ;;  %v4168_v52 = vld [vmem:[#allocation5 + $0x540] ss:$8 sps:$4 sm:$0xff]  }
 0x172   :  { %2917 = vmatprep.subr.bf16.mxu0 %v4085_v53  ;;  %v4171_v53 = vld [vmem:[#allocation5 + $0xb40] ss:$8 sps:$4 sm:$0xff]  }
 0x174   :  { %2672 = vmatpush1.bf16.msra.mxu1 %v4080_v54  ;;  %v4176_v54 = vld [vmem:[#allocation5 + $0x554] ss:$8 sps:$4 sm:$0xff]  }
 0x175   :  { %2918 = vmatpush1.bf16.msra.mxu0 %v4083_v55  ;;  %2673 = vmatprep.subr.bf16.mxu1 %v4088_v56  ;;  %v4179_v55 = vld [vmem:[#allocation5 + $0xb54] ss:$8 sps:$4 sm:$0xff]   ;;  %v4174_v56 = vld [vmem:[#allocation5 + $0x550] ss:$8 sps:$4 sm:$0xff]  }
 0x176   :  { %2919 = vmatprep.subr.bf16.mxu0 %v4091_v57  ;;  %v4177_v57 = vld [vmem:[#allocation5 + $0xb50] ss:$8 sps:$4 sm:$0xff]  }
 0x178   :  { %2674 = vmatpush1.bf16.msra.mxu1 %v4086_v58  ;;  %v4182_v58 = vld [vmem:[#allocation5 + $0x564] ss:$8 sps:$4 sm:$0xff]  }
 0x179   :  { %2920 = vmatpush1.bf16.msra.mxu0 %v4089_v59  ;;  %2675 = vmatprep.subr.bf16.mxu1 %v4094_v60  ;;  %v4185_v59 = vld [vmem:[#allocation5 + $0xb64] ss:$8 sps:$4 sm:$0xff]   ;;  %v4180_v60 = vld [vmem:[#allocation5 + $0x560] ss:$8 sps:$4 sm:$0xff]  }
 0x17a   :  { %2921 = vmatprep.subr.bf16.mxu0 %v4097_v61  ;;  %v4183_v61 = vld [vmem:[#allocation5 + $0xb60] ss:$8 sps:$4 sm:$0xff]  }
 0x17c   :  { %2676 = vmatpush1.bf16.msra.mxu1 %v4092_v62  ;;  %v4188_v62 = vld [vmem:[#allocation5 + $0x574] ss:$8 sps:$4 sm:$0xff]  }
 0x17d   :  { %2922 = vmatpush1.bf16.msra.mxu0 %v4095_v63  ;;  %2677 = vmatprep.subr.bf16.mxu1 %v4100_v0  ;;  %v4191_v63 = vld [vmem:[#allocation5 + $0xb74] ss:$8 sps:$4 sm:$0xff]   ;;  %v4186_v0 = vld [vmem:[#allocation5 + $0x570] ss:$8 sps:$4 sm:$0xff]  }
 0x17e   :  { %2923 = vmatprep.subr.bf16.mxu0 %v4103_v1  ;;  %v4189_v1 = vld [vmem:[#allocation5 + $0xb70] ss:$8 sps:$4 sm:$0xff]  }
 0x180   :  { %2678 = vmatpush1.bf16.msra.mxu1 %v4098_v2  ;;  %v4194_v2 = vld [vmem:[#allocation5 + $0x584] ss:$8 sps:$4 sm:$0xff]  }
 0x181   :  { %2924 = vmatpush1.bf16.msra.mxu0 %v4101_v3  ;;  %2679 = vmatprep.subr.bf16.mxu1 %v4106_v4  ;;  %v4197_v3 = vld [vmem:[#allocation5 + $0xb84] ss:$8 sps:$4 sm:$0xff]   ;;  %v4192_v4 = vld [vmem:[#allocation5 + $0x580] ss:$8 sps:$4 sm:$0xff]  }
 0x182   :  { %2925 = vmatprep.subr.bf16.mxu0 %v4109_v5  ;;  %v4195_v5 = vld [vmem:[#allocation5 + $0xb80] ss:$8 sps:$4 sm:$0xff]  }
 0x184   :  { %2680 = vmatpush1.bf16.msra.mxu1 %v4104_v6  ;;  %v4200_v6 = vld [vmem:[#allocation5 + $0x594] ss:$8 sps:$4 sm:$0xff]  }
 0x185   :  { %2926 = vmatpush1.bf16.msra.mxu0 %v4107_v7  ;;  %2681 = vmatprep.subr.bf16.mxu1 %v4112_v8  ;;  %v4203_v7 = vld [vmem:[#allocation5 + $0xb94] ss:$8 sps:$4 sm:$0xff]   ;;  %v4198_v8 = vld [vmem:[#allocation5 + $0x590] ss:$8 sps:$4 sm:$0xff]  }
 0x186   :  { %2927 = vmatprep.subr.bf16.mxu0 %v4115_v9  ;;  %v4201_v9 = vld [vmem:[#allocation5 + $0xb90] ss:$8 sps:$4 sm:$0xff]  }
 0x188   :  { %2682 = vmatpush1.bf16.msra.mxu1 %v4110_v10  ;;  %v4206_v10 = vld [vmem:[#allocation5 + $0x5a4] ss:$8 sps:$4 sm:$0xff]  }
 0x189   :  { %2928 = vmatpush1.bf16.msra.mxu0 %v4113_v11  ;;  %2683 = vmatprep.subr.bf16.mxu1 %v4118_v12  ;;  %v4209_v11 = vld [vmem:[#allocation5 + $0xba4] ss:$8 sps:$4 sm:$0xff]   ;;  %v4204_v12 = vld [vmem:[#allocation5 + $0x5a0] ss:$8 sps:$4 sm:$0xff]  }
 0x18a   :  { %2929 = vmatprep.subr.bf16.mxu0 %v4121_v13  ;;  %v4207_v13 = vld [vmem:[#allocation5 + $0xba0] ss:$8 sps:$4 sm:$0xff]  }
 0x18c   :  { %2684 = vmatpush1.bf16.msra.mxu1 %v4116_v14  ;;  %v4212_v14 = vld [vmem:[#allocation5 + $0x5b4] ss:$8 sps:$4 sm:$0xff]  }
 0x18d   :  { %2930 = vmatpush1.bf16.msra.mxu0 %v4119_v15  ;;  %2685 = vmatprep.subr.bf16.mxu1 %v4124_v16  ;;  %v4215_v15 = vld [vmem:[#allocation5 + $0xbb4] ss:$8 sps:$4 sm:$0xff]   ;;  %v4210_v16 = vld [vmem:[#allocation5 + $0x5b0] ss:$8 sps:$4 sm:$0xff]  }
 0x18e   :  { %2931 = vmatprep.subr.bf16.mxu0 %v4127_v17  ;;  %v4213_v17 = vld [vmem:[#allocation5 + $0xbb0] ss:$8 sps:$4 sm:$0xff]  }
 0x190   :  { %2686 = vmatpush1.bf16.msra.mxu1 %v4122_v19  ;;  %v4218_v19 = vld [vmem:[#allocation5 + $0x5c4] ss:$8 sps:$4 sm:$0xff]  }
 0x191   :  { %2932 = vmatpush1.bf16.msra.mxu0 %v4125_v21  ;;  %2687 = vmatprep.subr.bf16.mxu1 %v4130_v22  ;;  %v4221_v21 = vld [vmem:[#allocation5 + $0xbc4] ss:$8 sps:$4 sm:$0xff]   ;;  %v4216_v22 = vld [vmem:[#allocation5 + $0x5c0] ss:$8 sps:$4 sm:$0xff]  }
 0x192   :  { %2933 = vmatprep.subr.bf16.mxu0 %v4133_v23  ;;  %v4219_v23 = vld [vmem:[#allocation5 + $0xbc0] ss:$8 sps:$4 sm:$0xff]  }
 0x194   :  { %2688 = vmatpush1.bf16.msra.mxu1 %v4128_v26  ;;  %v4224_v26 = vld [vmem:[#allocation5 + $0x5d4] ss:$8 sps:$4 sm:$0xff]  }
 0x195   :  { %2934 = vmatpush1.bf16.msra.mxu0 %v4131_v27  ;;  %2689 = vmatprep.subr.bf16.mxu1 %v4136_v29  ;;  %v4227_v27 = vld [vmem:[#allocation5 + $0xbd4] ss:$8 sps:$4 sm:$0xff]   ;;  %v4222_v29 = vld [vmem:[#allocation5 + $0x5d0] ss:$8 sps:$4 sm:$0xff]  }
 0x196   :  { %2935 = vmatprep.subr.bf16.mxu0 %v4139_v18  ;;  %v4225_v18 = vld [vmem:[#allocation5 + $0xbd0] ss:$8 sps:$4 sm:$0xff]  }
 0x198   :  { %2690 = vmatpush1.bf16.msra.mxu1 %v4134_v30  ;;  %v4230_v30 = vld [vmem:[#allocation5 + $0x5e4] ss:$8 sps:$4 sm:$0xff]  }
 0x199   :  { %2936 = vmatpush1.bf16.msra.mxu0 %v4137_v31  ;;  %2700 = vmatprep.subr.bf16.mxu1 %v4144_v32  ;;  %v4233_v31 = vld [vmem:[#allocation5 + $0xbe4] ss:$8 sps:$4 sm:$0xff]   ;;  %v4228_v32 = vld [vmem:[#allocation5 + $0x5e0] ss:$8 sps:$4 sm:$0xff]  }
 0x19a   :  { %2946 = vmatprep.subr.bf16.mxu0 %v4149_v33  ;;  %v4231_v33 = vld [vmem:[#allocation5 + $0xbe0] ss:$8 sps:$4 sm:$0xff]  }
 0x19b   :  { %2692 = vmatmul.mubr.bf16.vlgmr.msra.gmra.mrb[0].mxu1 %v3124_v34  ;;  %v4236_v34 = vld [vmem:[#allocation5 + $0x5f4] ss:$8 sps:$4 sm:$0xff]  }
 0x19c   :  { %2938 = vmatmul.mubr.bf16.vlgmr.msra.gmra.mrb[0].mxu0 %v3136_v35  ;;  %2701 = vmatpush1.bf16.msra.mxu1 %v4142_v36  ;;  %v4239_v35 = vld [vmem:[#allocation5 + $0xbf4] ss:$8 sps:$4 sm:$0xff]   ;;  %v3005_v36 = vld [vmem:[#allocation8 + $0x80] sm:$0xff] }
 0x19d   :  { %2947 = vmatpush1.bf16.msra.mxu0 %v4147_v37  ;;  %2702 = vmatprep.subr.bf16.mxu1 %v4152_v38  ;;  %v3006_v37 = vld [vmem:[#allocation8 + $0x88] sm:$0xff] }
 0x19e   :  { %2948 = vmatprep.subr.bf16.mxu0 %v4155_v39  ;;  %2732 = vmatprep.mubr.bf16.mxu1 %v3127_v40  ;;  %v4234_v38 = vld [vmem:[#allocation5 + $0x5f0] ss:$8 sps:$4 sm:$0xff]   ;;  %v3560_v40 = vpack.c.bf16 %v3006_v37, %v3005_v36 }
 0x19f   :  { %2978 = vmatprep.mubr.bf16.mxu0 %v3139_v28  ;;  %v4237_v39 = vld [vmem:[#allocation5 + $0xbf0] ss:$8 sps:$4 sm:$0xff]   ;;  %v2989_v28 = vld [vmem:[#allocation8] sm:$0xff] }
 0x1a0   :  { %2703 = vmatpush1.bf16.msra.mxu1 %v4150_v20  ;;  %v2990_v20 = vld [vmem:[#allocation8 + $0x8] sm:$0xff] }
 0x1a1   :  { %2949 = vmatpush1.bf16.msra.mxu0 %v4153_v41  ;;  %2704 = vmatprep.subr.bf16.mxu1 %v4158_v42  ;;  %v3007_v41 = vld [vmem:[#allocation8 + $0x90] sm:$0xff]  ;;  %v3008_v42 = vld [vmem:[#allocation8 + $0x98] sm:$0xff] }
 0x1a2   :  { %2950 = vmatprep.subr.bf16.mxu0 %v4161_v43  ;;  %v3126_v43 = vcombine.low %v4530_v24, %v4530_v24  ;;  %v2994_v24 = vld [vmem:[#allocation8 + $0x28] sm:$0xff] }
 0x1a4   :  { %2705 = vmatpush1.bf16.msra.mxu1 %v4156_v44  ;;  %v3138_v44 = vcombine.low %v4532_v25, %v4532_v25 }
 0x1a5   :  { %2951 = vmatpush1.bf16.msra.mxu0 %v4159_v45  ;;  %2706 = vmatprep.subr.bf16.mxu1 %v4164_v46  ;;  %v3562_v45 = vpack.c.bf16 %v2990_v20, %v2989_v28  ;;  %v3564_v46 = vpack.c.bf16 %v3008_v42, %v3007_v41 }
 0x1a6   :  { %2952 = vmatprep.subr.bf16.mxu0 %v4167_v47  ;;  %v2991_v47 = vld [vmem:[#allocation8 + $0x10] sm:$0xff] }
 0x1a8   :  { %2707 = vmatpush1.bf16.msra.mxu1 %v4162_v48  ;;  %v2992_v48 = vld [vmem:[#allocation8 + $0x18] sm:$0xff] }
 0x1a9   :  { %2953 = vmatpush1.bf16.msra.mxu0 %v4165_v49  ;;  %2708 = vmatprep.subr.bf16.mxu1 %v4170_v50  ;;  %v3009_v49 = vld [vmem:[#allocation8 + $0xa0] sm:$0xff]  ;;  %v3010_v50 = vld [vmem:[#allocation8 + $0xa8] sm:$0xff] }
 0x1aa   :  { %2954 = vmatprep.subr.bf16.mxu0 %v4173_v51  ;;  %v3566_v51 = vpack.c.bf16 %v2992_v48, %v2991_v47 }
 0x1ac   :  { %2709 = vmatpush1.bf16.msra.mxu1 %v4168_v52  ;;  %v3568_v52 = vpack.c.bf16 %v3010_v50, %v3009_v49 }
 0x1ad   :  { %2955 = vmatpush1.bf16.msra.mxu0 %v4171_v53  ;;  %2710 = vmatprep.subr.bf16.mxu1 %v4176_v54  ;;  %v2993_v53 = vld [vmem:[#allocation8 + $0x20] sm:$0xff]  ;;  %v3011_v54 = vld [vmem:[#allocation8 + $0xb0] sm:$0xff] }
 0x1ae   :  { %2956 = vmatprep.subr.bf16.mxu0 %v4179_v55  ;;  %v3012_v55 = vld [vmem:[#allocation8 + $0xb8] sm:$0xff]  ;;  %v3570_v25 = vpack.c.bf16 %v2994_v24, %v2993_v53 }
 0x1b0   :  { %2711 = vmatpush1.bf16.msra.mxu1 %v4174_v56  ;;  %v3572_v56 = vpack.c.bf16 %v3012_v55, %v3011_v54 }
 0x1b1   :  { %2957 = vmatpush1.bf16.msra.mxu0 %v4177_v57  ;;  %2712 = vmatprep.subr.bf16.mxu1 %v4182_v58  ;;  %v2995_v57 = vld [vmem:[#allocation8 + $0x30] sm:$0xff]  ;;  %v2996_v58 = vld [vmem:[#allocation8 + $0x38] sm:$0xff] }
 0x1b2   :  { %2958 = vmatprep.subr.bf16.mxu0 %v4185_v59  ;;  %v3013_v59 = vld [vmem:[#allocation8 + $0xc0] sm:$0xff] }
 0x1b4   :  { %2713 = vmatpush1.bf16.msra.mxu1 %v4180_v60  ;;  %v3014_v60 = vld [vmem:[#allocation8 + $0xc8] sm:$0xff] }
 0x1b5   :  { %2959 = vmatpush1.bf16.msra.mxu0 %v4183_v61  ;;  %2714 = vmatprep.subr.bf16.mxu1 %v4188_v62  ;;  %v3574_v61 = vpack.c.bf16 %v2996_v58, %v2995_v57  ;;  %v3576_v62 = vpack.c.bf16 %v3014_v60, %v3013_v59 }
 0x1b6   :  { %2960 = vmatprep.subr.bf16.mxu0 %v4191_v63  ;;  %v2997_v63 = vld [vmem:[#allocation8 + $0x40] sm:$0xff] }
 0x1b8   :  { %2715 = vmatpush1.bf16.msra.mxu1 %v4186_v0  ;;  %v2998_v0 = vld [vmem:[#allocation8 + $0x48] sm:$0xff] }
 0x1b9   :  { %2961 = vmatpush1.bf16.msra.mxu0 %v4189_v1  ;;  %2716 = vmatprep.subr.bf16.mxu1 %v4194_v2  ;;  %v3015_v1 = vld [vmem:[#allocation8 + $0xd0] sm:$0xff]  ;;  %v3016_v2 = vld [vmem:[#allocation8 + $0xd8] sm:$0xff] }
 0x1ba   :  { %2962 = vmatprep.subr.bf16.mxu0 %v4197_v3  ;;  %v3578_v3 = vpack.c.bf16 %v2998_v0, %v2997_v63 }
 0x1bc   :  { %2717 = vmatpush1.bf16.msra.mxu1 %v4192_v4  ;;  %v3580_v4 = vpack.c.bf16 %v3016_v2, %v3015_v1 }
 0x1bd   :  { %2963 = vmatpush1.bf16.msra.mxu0 %v4195_v5  ;;  %2718 = vmatprep.subr.bf16.mxu1 %v4200_v6  ;;  %v2999_v5 = vld [vmem:[#allocation8 + $0x50] sm:$0xff]  ;;  %v3000_v6 = vld [vmem:[#allocation8 + $0x58] sm:$0xff] }
 0x1be   :  { %2964 = vmatprep.subr.bf16.mxu0 %v4203_v7  ;;  %v3582_v7 = vpack.c.bf16 %v3000_v6, %v2999_v5 }
 0x1c0   :  { %2719 = vmatpush1.bf16.msra.mxu1 %v4198_v8  ;;  %v3017_v8 = vld [vmem:[#allocation8 + $0xe0] sm:$0xff] }
 0x1c1   :  { %2965 = vmatpush1.bf16.msra.mxu0 %v4201_v9  ;;  %2720 = vmatprep.subr.bf16.mxu1 %v4206_v10  ;;  %v3018_v9 = vld [vmem:[#allocation8 + $0xe8] sm:$0xff] }
 0x1c2   :  { %2966 = vmatprep.subr.bf16.mxu0 %v4209_v11  ;;  %v3584_v10 = vpack.c.bf16 %v3018_v9, %v3017_v8  ;;  %v3001_v11 = vld [vmem:[#allocation8 + $0x60] sm:$0xff] }
 0x1c4   :  { %2721 = vmatpush1.bf16.msra.mxu1 %v4204_v12  ;;  %v3002_v12 = vld [vmem:[#allocation8 + $0x68] sm:$0xff] }
 0x1c5   :  { %2967 = vmatpush1.bf16.msra.mxu0 %v4207_v13  ;;  %2722 = vmatprep.subr.bf16.mxu1 %v4212_v14  ;;  %v3586_v13 = vpack.c.bf16 %v3002_v12, %v3001_v11  ;;  %v3019_v14 = vld [vmem:[#allocation8 + $0xf0] sm:$0xff] }
 0x1c6   :  { %2968 = vmatprep.subr.bf16.mxu0 %v4215_v15  ;;  %v3020_v15 = vld [vmem:[#allocation8 + $0xf8] sm:$0xff] }
 0x1c8   :  { %2723 = vmatpush1.bf16.msra.mxu1 %v4210_v16  ;;  %v3588_v16 = vpack.c.bf16 %v3020_v15, %v3019_v14 }
 0x1c9   :  { %2969 = vmatpush1.bf16.msra.mxu0 %v4213_v17  ;;  %2724 = vmatprep.subr.bf16.mxu1 %v4218_v19  ;;  %v3003_v17 = vld [vmem:[#allocation8 + $0x70] sm:$0xff]  ;;  %v3004_v19 = vld [vmem:[#allocation8 + $0x78] sm:$0xff] }
 0x1ca   :  { %2970 = vmatprep.subr.bf16.mxu0 %v4221_v21  ;;  %v3590_v21 = vpack.c.bf16 %v3004_v19, %v3003_v17 }
 0x1cc   :  { %2725 = vmatpush1.bf16.msra.mxu1 %v4216_v22  ;;  %v481_v22 = vlaneseq }
 0x1cd   :  { %2971 = vmatpush1.bf16.msra.mxu0 %v4219_v23  ;;  %2726 = vmatprep.subr.bf16.mxu1 %v4224_v26 }
 0x1ce   :  { %2972 = vmatprep.subr.bf16.mxu0 %v4227_v27  ;;  %v482_v23 = vshrl.u32 %v481_v22, 7  ;;  %v479_v27 = vld [vmem:[#allocation7] sm:$0x3] }
 0x1d0   :  { %2727 = vmatpush1.bf16.msra.mxu1 %v4222_v29  ;;  %v483_v26 = vsub.s32 0, %v482_v23  ;;  %v487_v29 = vsub.s32 1, %v482_v23 }
 0x1d1   :  { %2973 = vmatpush1.bf16.msra.mxu0 %v4225_v18  ;;  %2728 = vmatprep.subr.bf16.mxu1 %v4230_v30 }
 0x1d2   :  { %2974 = vmatprep.subr.bf16.mxu0 %v4233_v31  ;;  %v484_v18 = vrot.slane %v479_v27, %v483_v26  ;;  %v488_v30 = vrot.slane %v479_v27, %v487_v29 }
 0x1d4   :  { %2729 = vmatpush1.bf16.msra.mxu1 %v4228_v32 }
 0x1d5   :  { %2975 = vmatpush1.bf16.msra.mxu0 %v4231_v33  ;;  %2730 = vmatprep.subr.bf16.mxu1 %v4236_v34 }
 0x1d6   :  { %2976 = vmatprep.subr.bf16.mxu0 %v4239_v35 }
 0x1d8   :  { %2731 = vmatpush1.bf16.msra.mxu1 %v4234_v38 }
 0x1d9   :  { %2977 = vmatpush1.bf16.msra.mxu0 %v4237_v39  ;;  %3561 = vmatprep.subr.bf16.mxu1 %v3560_v40 }
 0x1db   :  { %2733 = vmatmul.mubr.bf16.vlgmr.msra.gmra.mrb[0].mxu1 %v3126_v43 }
 0x1dc   :  { %2979 = vmatmul.mubr.bf16.vlgmr.msra.gmra.mrb[0].mxu0 %v3138_v44  ;;  %3563 = vmatpush3.bf16.msra.mxu1 %v3562_v45  ;;  %v3524_v44 = vld [vmem:[#allocation10] ss:$0 sm:$0xff] }
 0x1dd   :  { %3565 = vmatprep.subr.bf16.mxu1 %v3564_v46 }
 0x1e0   :  { %3567 = vmatpush3.bf16.msra.mxu1 %v3566_v51 }
 0x1e1   :  { %3569 = vmatprep.subr.bf16.mxu1 %v3568_v52 }
 0x1e4   :  { %3571 = vmatpush3.bf16.msra.mxu1 %v3570_v25 }
 0x1e5   :  { %3573 = vmatprep.subr.bf16.mxu1 %v3572_v56 }
 0x1e8   :  { %3575 = vmatpush3.bf16.msra.mxu1 %v3574_v61 }
 0x1e9   :  { %3577 = vmatprep.subr.bf16.mxu1 %v3576_v62 }
 0x1ec   :  { %3579 = vmatpush3.bf16.msra.mxu1 %v3578_v3 }
 0x1ed   :  { %3581 = vmatprep.subr.bf16.mxu1 %v3580_v4 }
 0x1f0   :  { %3583 = vmatpush3.bf16.msra.mxu1 %v3582_v7 }
 0x1f1   :  { %3585 = vmatprep.subr.bf16.mxu1 %v3584_v10 }
 0x1f4   :  { %3587 = vmatpush3.bf16.msra.mxu1 %v3586_v13 }
 0x1f5   :  { %3589 = vmatprep.subr.bf16.mxu1 %v3588_v16 }
 0x1f8   :  { %3591 = vmatpush3.bf16.msra.mxu1 %v3590_v21 }
 0x2ae   :  { %v2734_v31 = vpop.f32.mrb[0].mxu1 }
 0x2af   :  { %v2980_v32 = vpop.f32.mrb[0].mxu0  ;;  %v3592_v33 = vadd.f32 %v2734_v31, %v484_v18  ;;  %v2736_v34 = vpop.f32.mrb[1].mxu1 }
 0x2b0   :  { %v2982_v35 = vpop.f32.mrb[1].mxu0  ;;  %v3594_v36 = vadd.f32 %v2736_v34, %v488_v30  ;;  %v2738_v37 = vpop.f32.mrb[2].mxu1 }
 0x2b1   :  { %v2984_v38 = vpop.f32.mrb[2].mxu0  ;;  %v3593_v39 = vadd.f32 %v3592_v33, %v2980_v32  ;;  %v2739_v40 = vpop.f32.mrb[3].mxu1 }
 0x2b2   :  { %v2985_v28 = vpop.f32.mrb[3].mxu0  ;;  %v3595_v20 = vadd.f32 %v3594_v36, %v2982_v35 }
 0x2b3   :  { %v2987_v42 = vmax.f32 %v3593_v39, 0.0 }
 0x2b4   :  { %v2988_v41 = vmax.f32 %v3595_v20, 0.0 }
 0x2b6   :  { %3092 = vmatprep.mubr.f32.mxu1 %v2988_v41 }
 0x2b7   :  { %3093 = vmatmul.mubr.f32.vlgmr.msra.gmra.mrb[4].mxu1 %v2987_v42 }
 0x38a   :  { %v3557_v43 = vpop.f32.mrb[4].mxu1 }
 0x38b   :  { %v3558_v45 = vpop.f32.mrb[5].mxu1 }
 0x38c   :  { %v3559_v46 = vadd.f32 %v3558_v45, %v3557_v43 }
 0x38e   :  { %v3095_v47 = vadd.f32 %v3559_v46, %v3524_v44 }
 0x390   :  { %3098 = vst [vmem:[#allocation11] sm:$0xff] %v3095_v47 }
 0x391   :  { %4365 = shalt.err (!%p4362_p2)
}
 0x392   :  { %s4366_s29 = scalar_lea.hbm %s4559_s5, 128 }
 0x393   :  { %p4367_p3 = scmp.ne.s32.totalorder %s4559_s5, %s4366_s29  ;;  %p4370_p4 = scmp.lt.u32.totalorder %s4366_s29, %s4559_s5 }
 0x395   :  { %p4372_p5 = pnand %p4370_p4, %p4367_p3 }
 0x397   :  { %4375 = shalt.err (!%p4372_p5)
}
 0x398   :  { %3108 = dma.vmem_to_hbm [thread:$0]  %s3106_s26, 128, %s4559_s5, [#allocation4]  }
 0x399   :  { %4382 = dma.done.wait [#allocation4], 128  }
 0x39a   :  { %4383 = vsyncadd [#allocation4], 4294967168 }
 0x39b   :  { %3112 = vsyncpa [#allocation3], 1 }
 0x39c   :  { %3113 = vsyncpa [#allocation6], 1 }
 0x39d   :  { %3114 = vsyncpa [#allocation9], 1 }
 0x39e   :  { %3115 = vsyncpa [#allocation4], 1 }

</bundles_post_ra>
